<compile_context>
chip_gen: v7x
topology: tpu7x:2x2x1
jax: 0.10.0
libtpu: 0.0.40
codegen_flags: <defaults>
</compile_context>

<pallas_src>
import functools

import jax
import jax.numpy as jnp
from jax import lax
from jax.experimental import pallas as pl
from jax.experimental.pallas import tpu as pltpu

NEG_SLOPE = 0.01                     # PyTorch leaky_relu default
VMEM_LIMIT = 32 * 1024 * 1024        # explicit scoped-VMEM request (safe on v5e/v6e/v7x)
OUT_PAD = 128                        # lane-dense padded width of every kernel output
MAX_TM = 4096                        # row-tile upper bound (per-tile VMEM << limit)
ROW_ALIGN = 16                       # bf16 sublane packing prefers 16-row alignment


# ----------------------------------------------------------------------------
# small helpers
# ----------------------------------------------------------------------------
def _round_up(n, m):
    return ((n + m - 1) // m) * m


def _leaky_relu(x):
    return jnp.where(x >= 0, x, NEG_SLOPE * x)


def _row_spec(tm, width):
    return pl.BlockSpec((tm, width), lambda i: (i, 0))


def _const_spec(shape):
    return pl.BlockSpec(shape, lambda i: (0, 0))


def _compiler_params():
    # Row axis is embarrassingly parallel -> sharded across v7x's two TensorCores,
    # harmless on single-TC v5e/v6e.  Explicit VMEM limit so v7x (64 MiB physical)
    # never inherits an oversized default.
    return pltpu.CompilerParams(
        dimension_semantics=("parallel",),
        vmem_limit_bytes=VMEM_LIMIT)


def _choose_tm(n_rows, max_tm=MAX_TM, align=ROW_ALIGN):
    """Pick a row tile: as large as possible (amortize ~0.35us/step overhead, big DMAs),
    16-row aligned, and shrunk so the row grid has >= 2 steps whenever the problem
    allows (so ("parallel",) actually splits work across both v7x TensorCores)."""
    n_rows = max(int(n_rows), 1)
    tm = min(max_tm, _round_up(n_rows, align))
    if _round_up(n_rows, tm) // tm < 2:              # grid would collapse to one step
        half = _round_up(-(-n_rows // 2), align)
        if align <= half < tm:
            tm = half
    return tm


def _pad_cols(a, width):
    return jnp.pad(a, ((0, 0), (0, width - a.shape[1])))


def _pad_vec(a, width):
    return jnp.pad(a, (0, width - a.shape[0]))


# ----------------------------------------------------------------------------
# Pallas kernels
# ----------------------------------------------------------------------------
def _mlp2_kernel(x_ref, w1_ref, b1_ref, w2_ref, b2_ref, o_ref):
    """Linear -> leaky_relu -> Linear on one row tile.  Matmul operands keep the
    streamed dtype (bf16 on the per-edge path), accumulation is f32, and the output
    width is the lane-dense OUT_PAD so the store is one unmasked (TM, 128) write."""
    h = (jnp.dot(x_ref[...], w1_ref[...], preferred_element_type=jnp.float32)
         + b1_ref[...])
    h = _leaky_relu(h)
    out = (jnp.dot(h.astype(w2_ref.dtype), w2_ref[...],
                   preferred_element_type=jnp.float32) + b2_ref[...])
    o_ref[...] = out.astype(o_ref.dtype)


def pallas_mlp2(x, w1, b1, w2, b2, *, tm, out_dtype=jnp.float32):
    """Row-tiled 2-layer MLP.  `x` must already be padded to a multiple of `tm` rows
    (padding is done ONCE in the forward, not per call).  Weights are VMEM-resident
    (constant index_map).  Output is (n, OUT_PAD) lane-dense; callers slice."""
    n, k = x.shape
    hid = w1.shape[1]
    o = w2.shape[1]
    assert n % tm == 0, (n, tm)
    return pl.pallas_call(
        _mlp2_kernel,
        out_shape=jax.ShapeDtypeStruct((n, o), out_dtype),
        grid_spec=pltpu.PrefetchScalarGridSpec(
            num_scalar_prefetch=0,
            grid=(n // tm,),
            in_specs=[_row_spec(tm, k),
                      _const_spec((k, hid)), _const_spec((1, hid)),
                      _const_spec((hid, o)), _const_spec((1, o))],
            out_specs=_row_spec(tm, o)),
        compiler_params=_compiler_params(),
    )(x, w1, b1, w2, b2)


def _fused_ln_heads_kernel(x_ref, gamma_ref, beta_ref, grot0_ref, grot1_ref,
                           w1s_ref, w1a_ref, w1b_ref, b1_ref, w2_ref, b2_ref,
                           o_ref, *, S, R):
    """Fused SO2LayerNorm + SO2OutU + SO2OutV + residual adds on one row tile.

    Single (TM, 128) packed input, static in-register slicing, first MLP layer as
    three partial matmuls (no in-kernel concat), both heads share one packed W1/W2,
    and a single unmasked (TM, 128) store: cols 0,1 = v_out, col 2 = u_out.
    """
    x = x_ref[...]                                   # (tm, PACK) f32
    xs = x[:, 0:S]
    xr0 = x[:, S:S + R]
    xr1 = x[:, S + R:S + 2 * R]
    ck = x[:, S + 2 * R:S + 3 * R]                   # cos(k*theta), pre-tiled over reps
    sk = x[:, S + 3 * R:S + 4 * R]
    ul = x[:, S + 4 * R:S + 4 * R + 1]               # u[:, -1]
    vl0 = x[:, S + 4 * R + 1:S + 4 * R + 2]          # v[:, -1, 0]
    vl1 = x[:, S + 4 * R + 2:S + 4 * R + 3]          # v[:, -1, 1]

    # ---- SO2LayerNorm (TODO(synk): source not provided; LN + rot-invariant RMS) ----
    mean = jnp.mean(xs, axis=1, keepdims=True)
    var = jnp.mean((xs - mean) ** 2, axis=1, keepdims=True)
    xs_n = (xs - mean) * lax.rsqrt(var + 1e-5) * gamma_ref[...] + beta_ref[...]

    ms = (jnp.sum(xr0 * xr0, axis=1, keepdims=True)
          + jnp.sum(xr1 * xr1, axis=1, keepdims=True)) * (1.0 / (2.0 * R))
    inv_rms = lax.rsqrt(ms + 1e-5)
    xr0n = xr0 * inv_rms * grot0_ref[...]
    xr1n = xr1 * inv_rms * grot1_ref[...]

    # ---- rotate into the invariant frame: x @ R_k^T  (R_k = [[c,-s],[s,c]]) ----
    a = xr0n * ck - xr1n * sk                        # l = 0 component
    b = xr0n * sk + xr1n * ck                        # l = 1 component

    # ---- shared packed MLP, first layer as 3 partial matmuls (no in-kernel concat) ---
    h = (jnp.dot(xs_n, w1s_ref[...], preferred_element_type=jnp.float32)
         + jnp.dot(a, w1a_ref[...], preferred_element_type=jnp.float32)
         + jnp.dot(b, w1b_ref[...], preferred_element_type=jnp.float32)
         + b1_ref[...])
    h = _leaky_relu(h)
    out = (jnp.dot(h, w2_ref[...], preferred_element_type=jnp.float32)
           + b2_ref[...])                            # (tm, 128): cols 0,1 = V(pre-rot), 2 = U

    # ---- V head back-rotation (out @ R_1) + residuals, written via a column mask ----
    c1 = ck[:, 0:1]
    s1 = sk[:, 0:1]
    v0 = out[:, 0:1]
    v1 = out[:, 1:2]
    uo = out[:, 2:3]
    vx = v0 * c1 + v1 * s1 + vl0
    vy = -v0 * s1 + v1 * c1 + vl1
    uu = uo + ul
    col = lax.broadcasted_iota(jnp.int32, out.shape, 1)
    o_ref[...] = jnp.where(col == 0, vx,
                 jnp.where(col == 1, vy,
                 jnp.where(col == 2, uu, out)))       # one unmasked (TM, 128) store


def fused_layernorm_heads(kp, cfg, xs, xr, ck_node, sk_node, u_last, v_last, *, tm):
    """One pallas_call per row tile for layer-norm + both output heads + residuals.
    Inputs are the already-padded node arrays (rows are a multiple of `tm`)."""
    n, num_rep, _ = xr.shape
    L, S = cfg.L_max, cfg.n_scalars
    R = num_rep * L
    assert n % tm == 0

    xr4 = xr.reshape(n, num_rep, L, 2)
    xr0 = xr4[..., 0].reshape(n, R)
    xr1 = xr4[..., 1].reshape(n, R)
    ck_rep = jnp.tile(ck_node, (1, num_rep))         # pre-tiled: no in-kernel replication
    sk_rep = jnp.tile(sk_node, (1, num_rep))

    packed = jnp.concatenate(
        [xs, xr0, xr1, ck_rep, sk_rep, u_last[:, None], v_last], axis=1)
    pack_w = _round_up(packed.shape[1], 128)         # one lane-dense input DMA per tile
    packed = _pad_cols(packed, pack_w)

    hp = kp['heads']
    hid2 = hp['w2'].shape[0]
    kernel = functools.partial(_fused_ln_heads_kernel, S=S, R=R)
    out = pl.pallas_call(
        kernel,
        out_shape=jax.ShapeDtypeStruct((n, OUT_PAD), jnp.float32),
        grid_spec=pltpu.PrefetchScalarGridSpec(
            num_scalar_prefetch=0,
            grid=(n // tm,),
            in_specs=[_row_spec(tm, pack_w),
                      _const_spec((1, S)), _const_spec((1, S)),
                      _const_spec((1, R)), _const_spec((1, R)),
                      _const_spec((S, hid2)), _const_spec((R, hid2)),
                      _const_spec((R, hid2)), _const_spec((1, hid2)),
                      _const_spec((hid2, OUT_PAD)), _const_spec((1, OUT_PAD))],
            out_specs=_row_spec(tm, OUT_PAD)),
        compiler_params=_compiler_params(),
    )(packed, kp['ln_gamma'], kp['ln_beta'], kp['ln_grot0'], kp['ln_grot1'],
      hp['w1s'], hp['w1a'], hp['w1b'], hp['b1'], hp['w2'], hp['b2'])
    return out[:, 2], out[:, 0:2]                    # (u_final, v_final), still padded rows


# ----------------------------------------------------------------------------
# Glue (preprocessing, graph ops) — runs in XLA around the kernels
# ----------------------------------------------------------------------------
def get_rot_tables(pos2d, L_max):
    """get_rot(pos, L_max) expressed as (cos(k*theta), sin(k*theta)) tables, k = 1..L."""
    theta = jnp.arctan2(pos2d[:, 1], pos2d[:, 0])
    ks = jnp.arange(1, L_max + 1, dtype=jnp.float32)
    ang = theta[:, None] * ks[None, :]
    return jnp.cos(ang), jnp.sin(ang)                # each (N, L_max)


def bessel_linspace(d, start=0.0, end=1.0, number=16):
    # TODO(synk): besel_linspace source not provided; bounded sinc radial-basis stand-in
    # (avoids 1/d blow-up on zero-length / padded edges).
    n = jnp.arange(1, number + 1, dtype=jnp.float32)
    x = (d[:, None] - start) / (end - start)
    return jnp.sinc(n[None, :] * x)


def node_embedding(kp, cfg, u, v, boundary_norm, y_force, is_boundary, ck, sk, *, tm):
    # TODO(synk): Node_embedding_vel source not provided; equivariance-preserving stand-in.
    n = u.shape[0]
    L, num_rep = cfg.L_max, cfg.num_rep
    vecs = jnp.concatenate(
        [v, boundary_norm[:, None, :], y_force[:, None, :]], axis=1)   # (n, nv, 2)
    vx, vy = vecs[..., 0], vecs[..., 1]
    c = ck[:, None, :]
    s = sk[:, None, :]
    r0 = vx[..., None] * c + vy[..., None] * s                          # (n, nv, L)
    r1 = -vx[..., None] * s + vy[..., None] * c
    rotated = jnp.stack([r0, r1], axis=-1)                              # (n, nv, L, 2)
    # tiny K (nv = 5) mix stays a plain einsum (a pallas_call here is launch overhead)
    x_rot = jnp.einsum('nvkl,vj->njkl', rotated, kp['emb_vec_w'])
    x_rot = x_rot.reshape(n, num_rep, L * 2)

    feats = jnp.concatenate(
        [u, is_boundary[:, None],
         jnp.linalg.norm(v, axis=-1),
         jnp.linalg.norm(boundary_norm, axis=-1, keepdims=True),
         jnp.linalg.norm(y_force, axis=-1, keepdims=True)], axis=1)
    xs_full = pallas_mlp2(feats, *kp['emb_scalar'], tm=tm)              # (n, 128) lane-dense
    return xs_full[:, :cfg.n_scalars], x_rot


def eq_block(blk, cfg, xs, xr, row, col, dist_emb_bf16, edge_mask, *, tm_edge):
    # TODO(synk): EqMLPBlock source not provided; invariant-gated message-passing stand-in.
    n, S = xs.shape
    num_rep = cfg.num_rep
    inv = jnp.sqrt(jnp.sum(xr * xr, axis=2) + 1e-8)                     # (n, num_rep)
    node_feat = jnp.concatenate([xs, inv], axis=1).astype(jnp.bfloat16)
    # TODO(synk): fusing the per-edge row gathers + segment-sum into Pallas (scalar-
    # prefetched row/col, edges sorted by col) is the next step; XLA handles them today.
    efeat = jnp.concatenate(
        [node_feat[row], node_feat[col], dist_emb_bf16], axis=1)        # (E_pad, 32) bf16
    msg_full = pallas_mlp2(efeat, *blk, tm=tm_edge, out_dtype=jnp.bfloat16)
    msg = msg_full[:, :S + num_rep].astype(jnp.float32) * edge_mask     # drop padded edges
    agg = jax.ops.segment_sum(msg, col, num_segments=n)                 # aggregate at target
    xs_new = xs + agg[:, :S]
    gate = jnp.tanh(agg[:, S:])
    xr_new = xr * (1.0 + gate[:, :, None])
    return xs_new, xr_new


# ----------------------------------------------------------------------------
# Model
# ----------------------------------------------------------------------------
class Config:
    time_slize = 3
    L_max = 4
    num_rep = 4
    r_dim = 8
    num_layers = 2
    n_scalars = 8


def init_params(key, cfg):
    """Logical (PyTorch-layout) parameters; `prepare_kernel_params` re-lays them out."""
    def nrm(k, shape, fan_in):
        return jax.random.normal(k, shape, dtype=jnp.float32) * (1.0 / (fan_in ** 0.5))

    keys = iter(jax.random.split(key, 64))
    p = {}
    nv = cfg.time_slize + 2
    p['emb_vec_w'] = nrm(next(keys), (nv, cfg.num_rep), nv)
    s_in = 2 * cfg.time_slize + 3
    s_hid = 3 * s_in
    p['emb_scalar'] = (nrm(next(keys), (s_in, s_hid), s_in),
                       jnp.zeros((s_hid,), jnp.float32),
                       nrm(next(keys), (s_hid, cfg.n_scalars), s_hid),
                       jnp.zeros((cfg.n_scalars,), jnp.float32))
    e_in = 2 * (cfg.n_scalars + cfg.num_rep) + cfg.r_dim
    e_hid = 3 * e_in
    e_out = cfg.n_scalars + cfg.num_rep
    p['blocks'] = []
    for _ in range(cfg.num_layers):
        p['blocks'].append((nrm(next(keys), (e_in, e_hid), e_in),
                            jnp.zeros((e_hid,), jnp.float32),
                            nrm(next(keys), (e_hid, e_out), e_hid),
                            jnp.zeros((e_out,), jnp.float32)))
    p['ln_gamma'] = jnp.ones((cfg.n_scalars,), jnp.float32)
    p['ln_beta'] = jnp.zeros((cfg.n_scalars,), jnp.float32)
    p['ln_grot'] = jnp.ones((cfg.num_rep * cfg.L_max * 2,), jnp.float32)

    dim = cfg.n_scalars + cfg.num_rep * cfg.L_max * 2
    hid = 3 * dim

    def head(n_out):
        return dict(w1=nrm(next(keys), (dim, hid), dim),
                    b1=jax.random.normal(next(keys), (hid,), jnp.float32) * 0.01,
                    w2=nrm(next(keys), (hid, n_out), hid),
                    b2=jnp.zeros((n_out,), jnp.float32))

    p['out_v'] = head(2)   # SO2OutV
    p['out_u'] = head(1)   # SO2OutU
    return p


def prepare_kernel_params(params, cfg):
    """One-time weight re-layout: bf16 on the per-edge path, zero-padded lane-dense
    (128-wide) output columns everywhere, edge hidden 96->128, packed-head W1 rows
    permuted from the torch concat order [scalars, interleaved (rep,k,l)] to
    [scalars | all l=0 | all l=1] and split into three row blocks, both heads hstacked
    and hidden padded 240->256."""
    S, L, num_rep = cfg.n_scalars, cfg.L_max, cfg.num_rep
    R = num_rep * L
    kp = {'emb_vec_w': params['emb_vec_w'],
          'ln_gamma': params['ln_gamma'].reshape(1, S),
          'ln_beta': params['ln_beta'].reshape(1, S)}
    grot = params['ln_grot'].reshape(num_rep, L, 2)
    kp['ln_grot0'] = grot[..., 0].reshape(1, R)
    kp['ln_grot1'] = grot[..., 1].reshape(1, R)

    # node scalar embedding MLP (f32, lane-dense padded output)
    w1, b1, w2, b2 = params['emb_scalar']
    kp['emb_scalar'] = (w1, b1.reshape(1, -1),
                        _pad_cols(w2, OUT_PAD), _pad_vec(b2, OUT_PAD).reshape(1, -1))

    # edge MLPs (bf16 weights, hidden padded to 128, lane-dense padded output)
    kp['blocks'] = []
    for (w1, b1, w2, b2) in params['blocks']:
        hid_p = _round_up(w1.shape[1], 128)
        w1p = _pad_cols(w1, hid_p)
        b1p = _pad_vec(b1, hid_p)
        w2p = jnp.zeros((hid_p, OUT_PAD), jnp.float32)
        w2p = w2p.at[:w2.shape[0], :w2.shape[1]].set(w2)
        b2p = _pad_vec(b2, OUT_PAD)
        kp['blocks'].append((w1p.astype(jnp.bfloat16), b1p.reshape(1, -1),
                             w2p.astype(jnp.bfloat16), b2p.reshape(1, -1)))

    # packed output heads (SO2OutV + SO2OutU share one first-layer matmul)
    rot_rows = S + 2 * jnp.arange(R)                 # l = 0 rows in torch concat order

    def permute_w1(w):
        return jnp.concatenate([w[:S], w[rot_rows], w[rot_rows + 1]], axis=0)

    w1v = permute_w1(params['out_v']['w1'])
    w1u = permute_w1(params['out_u']['w1'])
    hid = w1v.shape[1]
    hid2 = _round_up(2 * hid, 128)                   # 240 -> 256 (lane-dense hidden)
    w1p = _pad_cols(jnp.concatenate([w1v, w1u], axis=1), hid2)
    b1p = _pad_vec(jnp.concatenate([params['out_v']['b1'], params['out_u']['b1']]), hid2)
    w2p = jnp.zeros((hid2, OUT_PAD), jnp.float32)
    w2p = w2p.at[:hid, 0:2].set(params['out_v']['w2'])
    w2p = w2p.at[hid:2 * hid, 2:3].set(params['out_u']['w2'])
    b2p = jnp.zeros((OUT_PAD,), jnp.float32)
    b2p = b2p.at[0:2].set(params['out_v']['b2']).at[2].set(params['out_u']['b2'][0])
    kp['heads'] = dict(w1s=w1p[:S], w1a=w1p[S:S + R], w1b=w1p[S + R:S + 2 * R],
                       b1=b1p.reshape(1, -1), w2=w2p, b2=b2p.reshape(1, -1))
    return kp


def so2_message_passing_forward(kp, cfg, u, v, boundary_norm, is_boundary, y_force,
                                pos, edge_index):
    N = u.shape[0]
    E = edge_index.shape[1]
    tm_node = _choose_tm(N)
    tm_edge = _choose_tm(E)
    n_pad = _round_up(N, tm_node)
    e_pad = _round_up(E, tm_edge)

    # ---- preprocessing (torch.no_grad block), then pad N / E exactly ONCE ----
    pos = pos - pos.mean(axis=0)

    def pad_rows(a, rows):
        return jnp.pad(a, ((0, rows - a.shape[0]),) + ((0, 0),) * (a.ndim - 1))

    u_p = pad_rows(u, n_pad)
    v_p = pad_rows(v, n_pad)
    bn_p = pad_rows(boundary_norm, n_pad)
    ib_p = pad_rows(is_boundary, n_pad)
    yf_p = pad_rows(y_force, n_pad)
    pos_p = pad_rows(pos, n_pad)
    row = pad_rows(edge_index[0], e_pad)
    col = pad_rows(edge_index[1], e_pad)
    edge_mask = (jnp.arange(e_pad) < E).astype(jnp.float32)[:, None]

    ck_node, sk_node = get_rot_tables(pos_p, cfg.L_max)        # get_rot(pos, L_max)
    edge_vec = pos_p[row] - pos_p[col]
    distance = jnp.linalg.norm(edge_vec, axis=1)
    dist_emb = bessel_linspace(distance, 0.0, 1.0, cfg.r_dim).astype(jnp.bfloat16)

    # ---- node embedding ----
    xs, xr = node_embedding(kp, cfg, u_p, v_p, bn_p, yf_p, ib_p, ck_node, sk_node,
                            tm=tm_node)

    # ---- message-passing blocks ----
    for blk in kp['blocks']:
        xs, xr = eq_block(blk, cfg, xs, xr, row, col, dist_emb, edge_mask,
                          tm_edge=tm_edge)

    # ---- fused layer norm + SO2OutU + SO2OutV + residuals (exact head math) ----
    u_out, v_out = fused_layernorm_heads(kp, cfg, xs, xr, ck_node, sk_node,
                                         u_p[:, -1], v_p[:, -1, :], tm=tm_node)
    return u_out[:N], v_out[:N]


# ----------------------------------------------------------------------------
if __name__ == "__main__":
    cfg = Config()
    N, E = 16, 32
    key = jax.random.PRNGKey(0)
    k = iter(jax.random.split(key, 16))

    u = jax.random.normal(next(k), (N, cfg.time_slize), jnp.float32)
    v = jax.random.normal(next(k), (N, cfg.time_slize, 2), jnp.float32)
    boundary_norm = jax.random.normal(next(k), (N, 2), jnp.float32)
    is_boundary = (jax.random.uniform(next(k), (N,)) > 0.5).astype(jnp.float32)
    y_force = jax.random.normal(next(k), (N, 2), jnp.float32)
    pos = jax.random.normal(next(k), (N, 2), jnp.float32)
    row = jax.random.randint(next(k), (E,), 0, N, dtype=jnp.int32)
    col = jax.random.randint(next(k), (E,), 0, N, dtype=jnp.int32)
    edge_index = jnp.stack([row, col], axis=0)

    params = init_params(next(k), cfg)
    kparams = prepare_kernel_params(params, cfg)     # one-time weight re-layout (not traced)

    fwd = jax.jit(lambda p, *args: so2_message_passing_forward(p, cfg, *args))
    u_out, v_out = fwd(kparams, u, v, boundary_norm, is_boundary, y_force, pos, edge_index)
    jax.block_until_ready(u_out)
    jax.block_until_ready(v_out)
    assert u_out.shape == (N,) and v_out.shape == (N, 2)
    assert bool(jnp.all(jnp.isfinite(u_out))) and bool(jnp.all(jnp.isfinite(v_out)))
    print("KERNEL_OK")
</pallas_src>

<mosaic_0001>
module attributes {stable_mosaic.version = 11 : i64} {
  func.func @_mlp2_kernel(%arg0: i32, %arg1: memref<16x9xf32, #tpu.memory_space<vmem>>, %arg2: memref<9x27xf32, #tpu.memory_space<vmem>>, %arg3: memref<1x27xf32, #tpu.memory_space<vmem>>, %arg4: memref<27x128xf32, #tpu.memory_space<vmem>>, %arg5: memref<1x128xf32, #tpu.memory_space<vmem>>, %arg6: memref<16x128xf32, #tpu.memory_space<vmem>>) attributes {dimension_semantics = [#tpu.dimension_semantics<parallel>], iteration_bounds = array<i64: 1>, scalar_prefetch = 0 : i64, scratch_operands = 0 : i64, tpu.core_type = #tpu.core_type<tc>, window_params = [{transform_indices = @transform_0, window_bounds = array<i64: 16, 9>}, {pipeline_mode = #tpu.pipeline_mode<synchronous>, transform_indices = @transform_1, window_bounds = array<i64: 9, 27>}, {pipeline_mode = #tpu.pipeline_mode<synchronous>, transform_indices = @transform_2, window_bounds = array<i64: 1, 27>}, {pipeline_mode = #tpu.pipeline_mode<synchronous>, transform_indices = @transform_3, window_bounds = array<i64: 27, 128>}, {pipeline_mode = #tpu.pipeline_mode<synchronous>, transform_indices = @transform_4, window_bounds = array<i64: 1, 128>}, {transform_indices = @transform_5, window_bounds = array<i64: 16, 128>}]} {
    %c0 = arith.constant 0 : index
    %c0_0 = arith.constant 0 : index
    %0 = vector.load %arg1[%c0, %c0_0] : memref<16x9xf32, #tpu.memory_space<vmem>>, vector<16x9xf32>
    %c0_1 = arith.constant 0 : index
    %c0_2 = arith.constant 0 : index
    %1 = vector.load %arg2[%c0_1, %c0_2] : memref<9x27xf32, #tpu.memory_space<vmem>>, vector<9x27xf32>
    %cst = arith.constant dense<0.000000e+00> : vector<16x27xf32>
    %2 = tpu.matmul %0, %1, %cst {dimension_numbers = #tpu.dot_dimension_numbers<[1], [0], [0], [1], [0, 0, 1, 1], [], []>} : vector<16x9xf32>, vector<9x27xf32>, vector<16x27xf32> -> vector<16x27xf32>
    %c0_3 = arith.constant 0 : index
    %c0_4 = arith.constant 0 : index
    %3 = vector.load %arg3[%c0_3, %c0_4] : memref<1x27xf32, #tpu.memory_space<vmem>>, vector<1x27xf32>
    %4 = vector.broadcast %3 : vector<1x27xf32> to vector<16x27xf32>
    %5 = arith.addf %2, %4 : vector<16x27xf32>
    %cst_5 = arith.constant 0.000000e+00 : f32
    %6 = vector.broadcast %cst_5 : f32 to vector<16x27xf32>
    %7 = arith.cmpf oge, %5, %6 : vector<16x27xf32>
    %cst_6 = arith.constant 0.00999999977 : f32
    %8 = vector.broadcast %cst_6 : f32 to vector<16x27xf32>
    %9 = arith.mulf %8, %5 : vector<16x27xf32>
    %10 = arith.select %7, %5, %9 : vector<16x27xi1>, vector<16x27xf32>
    %c0_7 = arith.constant 0 : index
    %c0_8 = arith.constant 0 : index
    %11 = vector.load %arg4[%c0_7, %c0_8] : memref<27x128xf32, #tpu.memory_space<vmem>>, vector<27x128xf32>
    %cst_9 = arith.constant dense<0.000000e+00> : vector<16x128xf32>
    %12 = tpu.matmul %10, %11, %cst_9 {dimension_numbers = #tpu.dot_dimension_numbers<[1], [0], [0], [1], [0, 0, 1, 1], [], []>} : vector<16x27xf32>, vector<27x128xf32>, vector<16x128xf32> -> vector<16x128xf32>
    %c0_10 = arith.constant 0 : index
    %c0_11 = arith.constant 0 : index
    %13 = vector.load %arg5[%c0_10, %c0_11] : memref<1x128xf32, #tpu.memory_space<vmem>>, vector<1x128xf32>
    %14 = vector.broadcast %13 : vector<1x128xf32> to vector<16x128xf32>
    %15 = arith.addf %12, %14 : vector<16x128xf32>
    %c0_12 = arith.constant 0 : index
    %c0_13 = arith.constant 0 : index
    %16 = vector.load %arg6[%c0_12, %c0_13] : memref<16x128xf32, #tpu.memory_space<vmem>>, vector<16x128xf32>
    tpu.vector_store %arg6[%c0_12, %c0_13], %15 {strides = array<i32>} : memref<16x128xf32, #tpu.memory_space<vmem>>, vector<16x128xf32>,
    return
  }
  func.func @transform_0(%arg0: i32) -> (i32, i32) {
    %c0_i32 = arith.constant 0 : i32
    %c0_i32_0 = arith.constant 0 : i32
    return %arg0, %c0_i32 : i32, i32
  }
  func.func @transform_1(%arg0: i32) -> (i32, i32) {
    %c0_i32 = arith.constant 0 : i32
    %c0_i32_0 = arith.constant 0 : i32
    %c0_i32_1 = arith.constant 0 : i32
    return %c0_i32, %c0_i32_0 : i32, i32
  }
  func.func @transform_2(%arg0: i32) -> (i32, i32) {
    %c0_i32 = arith.constant 0 : i32
    %c0_i32_0 = arith.constant 0 : i32
    %c0_i32_1 = arith.constant 0 : i32
    return %c0_i32, %c0_i32_0 : i32, i32
  }
  func.func @transform_3(%arg0: i32) -> (i32, i32) {
    %c0_i32 = arith.constant 0 : i32
    %c0_i32_0 = arith.constant 0 : i32
    %c0_i32_1 = arith.constant 0 : i32
    return %c0_i32, %c0_i32_0 : i32, i32
  }
  func.func @transform_4(%arg0: i32) -> (i32, i32) {
    %c0_i32 = arith.constant 0 : i32
    %c0_i32_0 = arith.constant 0 : i32
    %c0_i32_1 = arith.constant 0 : i32
    return %c0_i32, %c0_i32_0 : i32, i32
  }
  func.func @transform_5(%arg0: i32) -> (i32, i32) {
    %c0_i32 = arith.constant 0 : i32
    %c0_i32_0 = arith.constant 0 : i32
    return %arg0, %c0_i32 : i32, i32
  }
}

module attributes {stable_mosaic.version = 11 : i64} {
  func.func @_mlp2_kernel(%arg0: i32, %arg1: memref<16x32xbf16, #tpu.memory_space<vmem>>, %arg2: memref<32x128xbf16, #tpu.memory_space<vmem>>, %arg3: memref<1x128xf32, #tpu.memory_space<vmem>>, %arg4: memref<128x128xbf16, #tpu.memory_space<vmem>>, %arg5: memref<1x128xf32, #tpu.memory_space<vmem>>, %arg6: memref<16x128xbf16, #tpu.memory_space<vmem>>) attributes {dimension_semantics = [#tpu.dimension_semantics<parallel>], iteration_bounds = array<i64: 2>, scalar_prefetch = 0 : i64, scratch_operands = 0 : i64, tpu.core_type = #tpu.core_type<tc>, window_params = [{transform_indices = @transform_0, window_bounds = array<i64: 16, 32>}, {pipeline_mode = #tpu.pipeline_mode<synchronous>, transform_indices = @transform_1, window_bounds = array<i64: 32, 128>}, {pipeline_mode = #tpu.pipeline_mode<synchronous>, transform_indices = @transform_2, window_bounds = array<i64: 1, 128>}, {pipeline_mode = #tpu.pipeline_mode<synchronous>, transform_indices = @transform_3, window_bounds = array<i64: 128, 128>}, {pipeline_mode = #tpu.pipeline_mode<synchronous>, transform_indices = @transform_4, window_bounds = array<i64: 1, 128>}, {transform_indices = @transform_5, window_bounds = array<i64: 16, 128>}]} {
    %c0 = arith.constant 0 : index
    %c0_0 = arith.constant 0 : index
    %0 = vector.load %arg1[%c0, %c0_0] : memref<16x32xbf16, #tpu.memory_space<vmem>>, vector<16x32xbf16>
    %c0_1 = arith.constant 0 : index
    %c0_2 = arith.constant 0 : index
    %1 = vector.load %arg2[%c0_1, %c0_2] : memref<32x128xbf16, #tpu.memory_space<vmem>>, vector<32x128xbf16>
    %cst = arith.constant dense<0.000000e+00> : vector<16x128xf32>
    %2 = tpu.matmul %0, %1, %cst {dimension_numbers = #tpu.dot_dimension_numbers<[1], [0], [0], [1], [0, 0, 1, 1], [], []>} : vector<16x32xbf16>, vector<32x128xbf16>, vector<16x128xf32> -> vector<16x128xf32>
    %c0_3 = arith.constant 0 : index
    %c0_4 = arith.constant 0 : index
    %3 = vector.load %arg3[%c0_3, %c0_4] : memref<1x128xf32, #tpu.memory_space<vmem>>, vector<1x128xf32>
    %4 = vector.broadcast %3 : vector<1x128xf32> to vector<16x128xf32>
    %5 = arith.addf %2, %4 : vector<16x128xf32>
    %cst_5 = arith.constant 0.000000e+00 : f32
    %6 = vector.broadcast %cst_5 : f32 to vector<16x128xf32>
    %7 = arith.cmpf oge, %5, %6 : vector<16x128xf32>
    %cst_6 = arith.constant 0.00999999977 : f32
    %8 = vector.broadcast %cst_6 : f32 to vector<16x128xf32>
    %9 = arith.mulf %8, %5 : vector<16x128xf32>
    %10 = arith.select %7, %5, %9 : vector<16x128xi1>, vector<16x128xf32>
    %11 = arith.truncf %10 : vector<16x128xf32> to vector<16x128xbf16>
    %c0_7 = arith.constant 0 : index
    %c0_8 = arith.constant 0 : index
    %12 = vector.load %arg4[%c0_7, %c0_8] : memref<128x128xbf16, #tpu.memory_space<vmem>>, vector<128x128xbf16>
    %cst_9 = arith.constant dense<0.000000e+00> : vector<16x128xf32>
    %13 = tpu.matmul %11, %12, %cst_9 {dimension_numbers = #tpu.dot_dimension_numbers<[1], [0], [0], [1], [0, 0, 1, 1], [], []>} : vector<16x128xbf16>, vector<128x128xbf16>, vector<16x128xf32> -> vector<16x128xf32>
    %c0_10 = arith.constant 0 : index
    %c0_11 = arith.constant 0 : index
    %14 = vector.load %arg5[%c0_10, %c0_11] : memref<1x128xf32, #tpu.memory_space<vmem>>, vector<1x128xf32>
    %15 = vector.broadcast %14 : vector<1x128xf32> to vector<16x128xf32>
    %16 = arith.addf %13, %15 : vector<16x128xf32>
    %17 = arith.truncf %16 : vector<16x128xf32> to vector<16x128xbf16>
    %c0_12 = arith.constant 0 : index
    %c0_13 = arith.constant 0 : index
    %18 = vector.load %arg6[%c0_12, %c0_13] : memref<16x128xbf16, #tpu.memory_space<vmem>>, vector<16x128xbf16>
    tpu.vector_store %arg6[%c0_12, %c0_13], %17 {strides = array<i32>} : memref<16x128xbf16, #tpu.memory_space<vmem>>, vector<16x128xbf16>,
    return
  }
  func.func @transform_0(%arg0: i32) -> (i32, i32) {
    %c0_i32 = arith.constant 0 : i32
    %c0_i32_0 = arith.constant 0 : i32
    return %arg0, %c0_i32 : i32, i32
  }
  func.func @transform_1(%arg0: i32) -> (i32, i32) {
    %c0_i32 = arith.constant 0 : i32
    %c0_i32_0 = arith.constant 0 : i32
    %c0_i32_1 = arith.constant 0 : i32
    return %c0_i32, %c0_i32_0 : i32, i32
  }
  func.func @transform_2(%arg0: i32) -> (i32, i32) {
    %c0_i32 = arith.constant 0 : i32
    %c0_i32_0 = arith.constant 0 : i32
    %c0_i32_1 = arith.constant 0 : i32
    return %c0_i32, %c0_i32_0 : i32, i32
  }
  func.func @transform_3(%arg0: i32) -> (i32, i32) {
    %c0_i32 = arith.constant 0 : i32
    %c0_i32_0 = arith.constant 0 : i32
    %c0_i32_1 = arith.constant 0 : i32
    return %c0_i32, %c0_i32_0 : i32, i32
  }
  func.func @transform_4(%arg0: i32) -> (i32, i32) {
    %c0_i32 = arith.constant 0 : i32
    %c0_i32_0 = arith.constant 0 : i32
    %c0_i32_1 = arith.constant 0 : i32
    return %c0_i32, %c0_i32_0 : i32, i32
  }
  func.func @transform_5(%arg0: i32) -> (i32, i32) {
    %c0_i32 = arith.constant 0 : i32
    %c0_i32_0 = arith.constant 0 : i32
    return %arg0, %c0_i32 : i32, i32
  }
}

module attributes {stable_mosaic.version = 11 : i64} {
  func.func @_fused_ln_heads_kernel(%arg0: i32, %arg1: memref<16x128xf32, #tpu.memory_space<vmem>>, %arg2: memref<1x8xf32, #tpu.memory_space<vmem>>, %arg3: memref<1x8xf32, #tpu.memory_space<vmem>>, %arg4: memref<1x16xf32, #tpu.memory_space<vmem>>, %arg5: memref<1x16xf32, #tpu.memory_space<vmem>>, %arg6: memref<8x256xf32, #tpu.memory_space<vmem>>, %arg7: memref<16x256xf32, #tpu.memory_space<vmem>>, %arg8: memref<16x256xf32, #tpu.memory_space<vmem>>, %arg9: memref<1x256xf32, #tpu.memory_space<vmem>>, %arg10: memref<256x128xf32, #tpu.memory_space<vmem>>, %arg11: memref<1x128xf32, #tpu.memory_space<vmem>>, %arg12: memref<16x128xf32, #tpu.memory_space<vmem>>) attributes {dimension_semantics = [#tpu.dimension_semantics<parallel>], iteration_bounds = array<i64: 1>, scalar_prefetch = 0 : i64, scratch_operands = 0 : i64, tpu.core_type = #tpu.core_type<tc>, window_params = [{transform_indices = @transform_0, window_bounds = array<i64: 16, 128>}, {pipeline_mode = #tpu.pipeline_mode<synchronous>, transform_indices = @transform_1, window_bounds = array<i64: 1, 8>}, {pipeline_mode = #tpu.pipeline_mode<synchronous>, transform_indices = @transform_2, window_bounds = array<i64: 1, 8>}, {pipeline_mode = #tpu.pipeline_mode<synchronous>, transform_indices = @transform_3, window_bounds = array<i64: 1, 16>}, {pipeline_mode = #tpu.pipeline_mode<synchronous>, transform_indices = @transform_4, window_bounds = array<i64: 1, 16>}, {pipeline_mode = #tpu.pipeline_mode<synchronous>, transform_indices = @transform_5, window_bounds = array<i64: 8, 256>}, {pipeline_mode = #tpu.pipeline_mode<synchronous>, transform_indices = @transform_6, window_bounds = array<i64: 16, 256>}, {pipeline_mode = #tpu.pipeline_mode<synchronous>, transform_indices = @transform_7, window_bounds = array<i64: 16, 256>}, {pipeline_mode = #tpu.pipeline_mode<synchronous>, transform_indices = @transform_8, window_bounds = array<i64: 1, 256>}, {pipeline_mode = #tpu.pipeline_mode<synchronous>, transform_indices = @transform_9, window_bounds = array<i64: 256, 128>}, {pipeline_mode = #tpu.pipeline_mode<synchronous>, transform_indices = @transform_10, window_bounds = array<i64: 1, 128>}, {transform_indices = @transform_11, window_bounds = array<i64: 16, 128>}]} {
    %c0 = arith.constant 0 : index
    %c0_0 = arith.constant 0 : index
    %0 = vector.load %arg1[%c0, %c0_0] : memref<16x128xf32, #tpu.memory_space<vmem>>, vector<16x128xf32>
    %1 = vector.extract_strided_slice %0 {offsets = [0, 0], sizes = [16, 8], strides = [1, 1]} : vector<16x128xf32> to vector<16x8xf32>
    %2 = vector.extract_strided_slice %0 {offsets = [0, 8], sizes = [16, 16], strides = [1, 1]} : vector<16x128xf32> to vector<16x16xf32>
    %3 = vector.extract_strided_slice %0 {offsets = [0, 24], sizes = [16, 16], strides = [1, 1]} : vector<16x128xf32> to vector<16x16xf32>
    %4 = vector.extract_strided_slice %0 {offsets = [0, 40], sizes = [16, 16], strides = [1, 1]} : vector<16x128xf32> to vector<16x16xf32>
    %5 = vector.extract_strided_slice %0 {offsets = [0, 56], sizes = [16, 16], strides = [1, 1]} : vector<16x128xf32> to vector<16x16xf32>
    %6 = vector.extract_strided_slice %0 {offsets = [0, 72], sizes = [16, 1], strides = [1, 1]} : vector<16x128xf32> to vector<16x1xf32>
    %7 = vector.extract_strided_slice %0 {offsets = [0, 73], sizes = [16, 1], strides = [1, 1]} : vector<16x128xf32> to vector<16x1xf32>
    %8 = vector.extract_strided_slice %0 {offsets = [0, 74], sizes = [16, 1], strides = [1, 1]} : vector<16x128xf32> to vector<16x1xf32>
    %cst = arith.constant dense<0.000000e+00> : vector<16xf32>
    %9 = vector.multi_reduction <add>, %1, %cst [1] : vector<16x8xf32> to vector<16xf32>
    %10 = vector.shape_cast %9 : vector<16xf32> to vector<16x1xf32>
    %cst_1 = arith.constant 8.000000e+00 : f32
    %11 = vector.broadcast %cst_1 : f32 to vector<16x1xf32>
    %12 = arith.divf %10, %11 : vector<16x1xf32>
    %13 = vector.broadcast %12 : vector<16x1xf32> to vector<16x8xf32>
    %14 = arith.subf %1, %13 : vector<16x8xf32>
    %15 = arith.mulf %14, %14 : vector<16x8xf32>
    %cst_2 = arith.constant dense<0.000000e+00> : vector<16xf32>
    %16 = vector.multi_reduction <add>, %15, %cst_2 [1] : vector<16x8xf32> to vector<16xf32>
    %17 = vector.shape_cast %16 : vector<16xf32> to vector<16x1xf32>
    %cst_3 = arith.constant 8.000000e+00 : f32
    %18 = vector.broadcast %cst_3 : f32 to vector<16x1xf32>
    %19 = arith.divf %17, %18 : vector<16x1xf32>
    %20 = vector.broadcast %12 : vector<16x1xf32> to vector<16x8xf32>
    %21 = arith.subf %1, %20 : vector<16x8xf32>
    %cst_4 = arith.constant 9.99999974E-6 : f32
    %22 = vector.broadcast %cst_4 : f32 to vector<16x1xf32>
    %23 = arith.addf %19, %22 : vector<16x1xf32>
    %24 = math.rsqrt %23 : vector<16x1xf32>
    %25 = vector.broadcast %24 : vector<16x1xf32> to vector<16x8xf32>
    %26 = arith.mulf %21, %25 : vector<16x8xf32>
    %c0_5 = arith.constant 0 : index
    %c0_6 = arith.constant 0 : index
    %27 = vector.load %arg2[%c0_5, %c0_6] : memref<1x8xf32, #tpu.memory_space<vmem>>, vector<1x8xf32>
    %28 = vector.broadcast %27 : vector<1x8xf32> to vector<16x8xf32>
    %29 = arith.mulf %26, %28 : vector<16x8xf32>
    %c0_7 = arith.constant 0 : index
    %c0_8 = arith.constant 0 : index
    %30 = vector.load %arg3[%c0_7, %c0_8] : memref<1x8xf32, #tpu.memory_space<vmem>>, vector<1x8xf32>
    %31 = vector.broadcast %30 : vector<1x8xf32> to vector<16x8xf32>
    %32 = arith.addf %29, %31 : vector<16x8xf32>
    %33 = arith.mulf %2, %2 : vector<16x16xf32>
    %cst_9 = arith.constant dense<0.000000e+00> : vector<16xf32>
    %34 = vector.multi_reduction <add>, %33, %cst_9 [1] : vector<16x16xf32> to vector<16xf32>
    %35 = vector.shape_cast %34 : vector<16xf32> to vector<16x1xf32>
    %36 = arith.mulf %3, %3 : vector<16x16xf32>
    %cst_10 = arith.constant dense<0.000000e+00> : vector<16xf32>
    %37 = vector.multi_reduction <add>, %36, %cst_10 [1] : vector<16x16xf32> to vector<16xf32>
    %38 = vector.shape_cast %37 : vector<16xf32> to vector<16x1xf32>
    %39 = arith.addf %35, %38 : vector<16x1xf32>
    %cst_11 = arith.constant 3.125000e-02 : f32
    %40 = vector.broadcast %cst_11 : f32 to vector<16x1xf32>
    %41 = arith.mulf %39, %40 : vector<16x1xf32>
    %cst_12 = arith.constant 9.99999974E-6 : f32
    %42 = vector.broadcast %cst_12 : f32 to vector<16x1xf32>
    %43 = arith.addf %41, %42 : vector<16x1xf32>
    %44 = math.rsqrt %43 : vector<16x1xf32>
    %45 = vector.broadcast %44 : vector<16x1xf32> to vector<16x16xf32>
    %46 = arith.mulf %2, %45 : vector<16x16xf32>
    %c0_13 = arith.constant 0 : index
    %c0_14 = arith.constant 0 : index
    %47 = vector.load %arg4[%c0_13, %c0_14] : memref<1x16xf32, #tpu.memory_space<vmem>>, vector<1x16xf32>
    %48 = vector.broadcast %47 : vector<1x16xf32> to vector<16x16xf32>
    %49 = arith.mulf %46, %48 : vector<16x16xf32>
    %50 = vector.broadcast %44 : vector<16x1xf32> to vector<16x16xf32>
    %51 = arith.mulf %3, %50 : vector<16x16xf32>
    %c0_15 = arith.constant 0 : index
    %c0_16 = arith.constant 0 : index
    %52 = vector.load %arg5[%c0_15, %c0_16] : memref<1x16xf32, #tpu.memory_space<vmem>>, vector<1x16xf32>
    %53 = vector.broadcast %52 : vector<1x16xf32> to vector<16x16xf32>
    %54 = arith.mulf %51, %53 : vector<16x16xf32>
    %55 = arith.mulf %49, %4 : vector<16x16xf32>
    %56 = arith.mulf %54, %5 : vector<16x16xf32>
    %57 = arith.subf %55, %56 : vector<16x16xf32>
    %58 = arith.mulf %49, %5 : vector<16x16xf32>
    %59 = arith.mulf %54, %4 : vector<16x16xf32>
    %60 = arith.addf %58, %59 : vector<16x16xf32>
    %c0_17 = arith.constant 0 : index
    %c0_18 = arith.constant 0 : index
    %61 = vector.load %arg6[%c0_17, %c0_18] : memref<8x256xf32, #tpu.memory_space<vmem>>, vector<8x256xf32>
    %cst_19 = arith.constant dense<0.000000e+00> : vector<16x256xf32>
    %62 = tpu.matmul %32, %61, %cst_19 {dimension_numbers = #tpu.dot_dimension_numbers<[1], [0], [0], [1], [0, 0, 1, 1], [], []>} : vector<16x8xf32>, vector<8x256xf32>, vector<16x256xf32> -> vector<16x256xf32>
    %c0_20 = arith.constant 0 : index
    %c0_21 = arith.constant 0 : index
    %63 = vector.load %arg7[%c0_20, %c0_21] : memref<16x256xf32, #tpu.memory_space<vmem>>, vector<16x256xf32>
    %cst_22 = arith.constant dense<0.000000e+00> : vector<16x256xf32>
    %64 = tpu.matmul %57, %63, %cst_22 {dimension_numbers = #tpu.dot_dimension_numbers<[1], [0], [0], [1], [0, 0, 1, 1], [], []>} : vector<16x16xf32>, vector<16x256xf32>, vector<16x256xf32> -> vector<16x256xf32>
    %65 = arith.addf %62, %64 : vector<16x256xf32>
    %c0_23 = arith.constant 0 : index
    %c0_24 = arith.constant 0 : index
    %66 = vector.load %arg8[%c0_23, %c0_24] : memref<16x256xf32, #tpu.memory_space<vmem>>, vector<16x256xf32>
    %cst_25 = arith.constant dense<0.000000e+00> : vector<16x256xf32>
    %67 = tpu.matmul %60, %66, %cst_25 {dimension_numbers = #tpu.dot_dimension_numbers<[1], [0], [0], [1], [0, 0, 1, 1], [], []>} : vector<16x16xf32>, vector<16x256xf32>, vector<16x256xf32> -> vector<16x256xf32>
    %68 = arith.addf %65, %67 : vector<16x256xf32>
    %c0_26 = arith.constant 0 : index
    %c0_27 = arith.constant 0 : index
    %69 = vector.load %arg9[%c0_26, %c0_27] : memref<1x256xf32, #tpu.memory_space<vmem>>, vector<1x256xf32>
    %70 = vector.broadcast %69 : vector<1x256xf32> to vector<16x256xf32>
    %71 = arith.addf %68, %70 : vector<16x256xf32>
    %cst_28 = arith.constant 0.000000e+00 : f32
    %72 = vector.broadcast %cst_28 : f32 to vector<16x256xf32>
    %73 = arith.cmpf oge, %71, %72 : vector<16x256xf32>
    %cst_29 = arith.constant 0.00999999977 : f32
    %74 = vector.broadcast %cst_29 : f32 to vector<16x256xf32>
    %75 = arith.mulf %74, %71 : vector<16x256xf32>
    %76 = arith.select %73, %71, %75 : vector<16x256xi1>, vector<16x256xf32>
    %c0_30 = arith.constant 0 : index
    %c0_31 = arith.constant 0 : index
    %77 = vector.load %arg10[%c0_30, %c0_31] : memref<256x128xf32, #tpu.memory_space<vmem>>, vector<256x128xf32>
    %cst_32 = arith.constant dense<0.000000e+00> : vector<16x128xf32>
    %78 = tpu.matmul %76, %77, %cst_32 {dimension_numbers = #tpu.dot_dimension_numbers<[1], [0], [0], [1], [0, 0, 1, 1], [], []>} : vector<16x256xf32>, vector<256x128xf32>, vector<16x128xf32> -> vector<16x128xf32>
    %c0_33 = arith.constant 0 : index
    %c0_34 = arith.constant 0 : index
    %79 = vector.load %arg11[%c0_33, %c0_34] : memref<1x128xf32, #tpu.memory_space<vmem>>, vector<1x128xf32>
    %80 = vector.broadcast %79 : vector<1x128xf32> to vector<16x128xf32>
    %81 = arith.addf %78, %80 : vector<16x128xf32>
    %82 = vector.extract_strided_slice %4 {offsets = [0, 0], sizes = [16, 1], strides = [1, 1]} : vector<16x16xf32> to vector<16x1xf32>
    %83 = vector.extract_strided_slice %5 {offsets = [0, 0], sizes = [16, 1], strides = [1, 1]} : vector<16x16xf32> to vector<16x1xf32>
    %84 = vector.extract_strided_slice %81 {offsets = [0, 0], sizes = [16, 1], strides = [1, 1]} : vector<16x128xf32> to vector<16x1xf32>
    %85 = vector.extract_strided_slice %81 {offsets = [0, 1], sizes = [16, 1], strides = [1, 1]} : vector<16x128xf32> to vector<16x1xf32>
    %86 = vector.extract_strided_slice %81 {offsets = [0, 2], sizes = [16, 1], strides = [1, 1]} : vector<16x128xf32> to vector<16x1xf32>
    %87 = arith.mulf %84, %82 : vector<16x1xf32>
    %88 = arith.mulf %85, %83 : vector<16x1xf32>
    %89 = arith.addf %87, %88 : vector<16x1xf32>
    %90 = arith.addf %89, %7 : vector<16x1xf32>
    %cst_35 = arith.constant 0.000000e+00 : f32
    %91 = vector.broadcast %cst_35 : f32 to vector<16x1xf32>
    %92 = arith.subf %91, %84 : vector<16x1xf32>
    %93 = arith.mulf %92, %83 : vector<16x1xf32>
    %94 = arith.mulf %85, %82 : vector<16x1xf32>
    %95 = arith.addf %93, %94 : vector<16x1xf32>
    %96 = arith.addf %95, %8 : vector<16x1xf32>
    %97 = arith.addf %86, %6 : vector<16x1xf32>
    %98 = tpu.iota {dimensions = array<i32: 1>} : vector<16x128xi32>
    %c0_i32 = arith.constant 0 : i32
    %99 = vector.broadcast %c0_i32 : i32 to vector<16x128xi32>
    %100 = arith.cmpi eq, %98, %99 : vector<16x128xi32>
    %c1_i32 = arith.constant 1 : i32
    %101 = vector.broadcast %c1_i32 : i32 to vector<16x128xi32>
    %102 = arith.cmpi eq, %98, %101 : vector<16x128xi32>
    %c2_i32 = arith.constant 2 : i32
    %103 = vector.broadcast %c2_i32 : i32 to vector<16x128xi32>
    %104 = arith.cmpi eq, %98, %103 : vector<16x128xi32>
    %105 = vector.shape_cast %97 : vector<16x1xf32> to vector<16x1xf32>
    %106 = vector.broadcast %105 : vector<16x1xf32> to vector<16x128xf32>
    %107 = arith.select %104, %106, %81 : vector<16x128xi1>, vector<16x128xf32>
    %108 = vector.shape_cast %96 : vector<16x1xf32> to vector<16x1xf32>
    %109 = vector.broadcast %108 : vector<16x1xf32> to vector<16x128xf32>
    %110 = arith.select %102, %109, %107 : vector<16x128xi1>, vector<16x128xf32>
    %111 = vector.shape_cast %90 : vector<16x1xf32> to vector<16x1xf32>
    %112 = vector.broadcast %111 : vector<16x1xf32> to vector<16x128xf32>
    %113 = arith.select %100, %112, %110 : vector<16x128xi1>, vector<16x128xf32>
    %c0_36 = arith.constant 0 : index
    %c0_37 = arith.constant 0 : index
    %114 = vector.load %arg12[%c0_36, %c0_37] : memref<16x128xf32, #tpu.memory_space<vmem>>, vector<16x128xf32>
    tpu.vector_store %arg12[%c0_36, %c0_37], %113 {strides = array<i32>} : memref<16x128xf32, #tpu.memory_space<vmem>>, vector<16x128xf32>,
    return
  }
  func.func @transform_0(%arg0: i32) -> (i32, i32) {
    %c0_i32 = arith.constant 0 : i32
    %c0_i32_0 = arith.constant 0 : i32
    return %arg0, %c0_i32 : i32, i32
  }
  func.func @transform_1(%arg0: i32) -> (i32, i32) {
    %c0_i32 = arith.constant 0 : i32
    %c0_i32_0 = arith.constant 0 : i32
    %c0_i32_1 = arith.constant 0 : i32
    return %c0_i32, %c0_i32_0 : i32, i32
  }
  func.func @transform_2(%arg0: i32) -> (i32, i32) {
    %c0_i32 = arith.constant 0 : i32
    %c0_i32_0 = arith.constant 0 : i32
    %c0_i32_1 = arith.constant 0 : i32
    return %c0_i32, %c0_i32_0 : i32, i32
  }
  func.func @transform_3(%arg0: i32) -> (i32, i32) {
    %c0_i32 = arith.constant 0 : i32
    %c0_i32_0 = arith.constant 0 : i32
    %c0_i32_1 = arith.constant 0 : i32
    return %c0_i32, %c0_i32_0 : i32, i32
  }
  func.func @transform_4(%arg0: i32) -> (i32, i32) {
    %c0_i32 = arith.constant 0 : i32
    %c0_i32_0 = arith.constant 0 : i32
    %c0_i32_1 = arith.constant 0 : i32
    return %c0_i32, %c0_i32_0 : i32, i32
  }
  func.func @transform_5(%arg0: i32) -> (i32, i32) {
    %c0_i32 = arith.constant 0 : i32
    %c0_i32_0 = arith.constant 0 : i32
    %c0_i32_1 = arith.constant 0 : i32
    return %c0_i32, %c0_i32_0 : i32, i32
  }
  func.func @transform_6(%arg0: i32) -> (i32, i32) {
    %c0_i32 = arith.constant 0 : i32
    %c0_i32_0 = arith.constant 0 : i32
    %c0_i32_1 = arith.constant 0 : i32
    return %c0_i32, %c0_i32_0 : i32, i32
  }
  func.func @transform_7(%arg0: i32) -> (i32, i32) {
    %c0_i32 = arith.constant 0 : i32
    %c0_i32_0 = arith.constant 0 : i32
    %c0_i32_1 = arith.constant 0 : i32
    return %c0_i32, %c0_i32_0 : i32, i32
  }
  func.func @transform_8(%arg0: i32) -> (i32, i32) {
    %c0_i32 = arith.constant 0 : i32
    %c0_i32_0 = arith.constant 0 : i32
    %c0_i32_1 = arith.constant 0 : i32
    return %c0_i32, %c0_i32_0 : i32, i32
  }
  func.func @transform_9(%arg0: i32) -> (i32, i32) {
    %c0_i32 = arith.constant 0 : i32
    %c0_i32_0 = arith.constant 0 : i32
    %c0_i32_1 = arith.constant 0 : i32
    return %c0_i32, %c0_i32_0 : i32, i32
  }
  func.func @transform_10(%arg0: i32) -> (i32, i32) {
    %c0_i32 = arith.constant 0 : i32
    %c0_i32_0 = arith.constant 0 : i32
    %c0_i32_1 = arith.constant 0 : i32
    return %c0_i32, %c0_i32_0 : i32, i32
  }
  func.func @transform_11(%arg0: i32) -> (i32, i32) {
    %c0_i32 = arith.constant 0 : i32
    %c0_i32_0 = arith.constant 0 : i32
    return %arg0, %c0_i32 : i32, i32
  }
}

</mosaic_0001>

<bundles_post_ra>
// kernel: _lambda_.4
= control target key start
LH: loop header
LB: loop body
LE: loop exit
PB: predicated region body
PF: predicated region fallthrough
CT: control target
= control target key end

     0   :  { %vm38_vm0 = vcmask 1040384   ;;  %vm31_vm1 = vcmask 72704   ;;  %vm279_vm2 = vmmov 1   ;;  %vm141_vm4 = vcmask 1042432   ;;  %s348_s1 = inlined_call_operand.vmem [shape: f32[9,27], index: 1, kind: input, shape index: {}]   ;;  %s349_s0 = inlined_call_operand.vmem [shape: f32[16,9], index: 0, kind: input, shape index: {}]   ;;  %s350_s3 = inlined_call_operand.vmem [shape: f32[27,128], index: 3, kind: input, shape index: {}]   ;;  %s351_s2 = inlined_call_operand.vmem [shape: f32[1,27], index: 2, kind: input, shape index: {}]   ;;  %s352_s4 = inlined_call_operand.vmem [shape: f32[1,128], index: 4, kind: input, shape index: {}]   ;;  %s353_s5 = inlined_call_operand.vmem [shape: f32[16,128], index: 5, kind: output, shape index: {}]  }
   0x1   :  { %v22_v0 = vld [vmem:[%s348_s1] sm:$0xff]  ;;  %v23_v1 = vld [vmem:[%s348_s1 + $0x8] sm:$0x1]  ;;  %vm263_vm3 = vmpackc.low %vm38_vm0, %vm279_vm2  ;;  %vm134_vm8 = vcmask 220160  }
   0x2   :  { %v262_v2 = vpack.c.bf16 %v23_v1, %v22_v0  ;;  %v20_v3 = vld [vmem:[%s349_s0] sm:$0xff]  ;;  %v21_v4 = vld [vmem:[%s349_s0 + $0x8] sm:$0xff]  ;;  %vm273_vm5 = vmpackc.low %vm141_vm4, %vm279_vm2 }
   0x3   :  { %248 = vmatprep.mubr.msk.f32.mxu0 %vm31_vm1, %v20_v3  ;;  %v123_v5 = vld [vmem:[%s350_s3] sm:$0xff]  ;;  %v124_v6 = vld [vmem:[%s350_s3 + $0x8] sm:$0xff]  ;;  %v125_v8 = vld [vmem:[%s350_s3 + $0x10] sm:$0xff] }
   0x4   :  { %264 = vmatprep.subr.msk.bf16.mxu0 %vm263_vm3, %v262_v2  ;;  %v268_v7 = vpack.c.bf16 %v124_v6, %v123_v5  ;;  %v126_v9 = vld [vmem:[%s350_s3 + $0x18] sm:$0x7]  ;;  %v226_v11 = vld [vmem:[%s351_s2] ss:$0 sm:$0xff] }
   0x5   :  { %267 = vmatpush3.bf16.msk.msra.mxu0 %vm263_vm3, %v262_v2  ;;  %v272_v10 = vpack.c.bf16 %v126_v9, %v125_v8  ;;  %v230_v20 = vld [vmem:[%s352_s4] ss:$0 sm:$0xff] }
   0x6   :  { %269 = vmatprep.subr.bf16.mxu1 %v268_v7 }
   0x7   :  { %271 = vmatpush3.bf16.msra.mxu1 %v268_v7 }
   0x8   :  { %249 = vmatmul.mubr.msk.f32.vlgmr.msra.gmra.mrb[0].mxu0 %vm31_vm1, %v21_v4  ;;  %274 = vmatprep.subr.msk.bf16.mxu1 %vm273_vm5, %v272_v10 }
   0xb   :  { %277 = vmatpush3.bf16.msk.msra.mxu1 %vm273_vm5, %v272_v10 }
  0xdb   :  { %v250_v12 = vpop.f32.mrb[0].mxu0 }
  0xdc   :  { %v114_v13 = vadd.f32 %v250_v12, %v226_v11  ;;  %v108_v14 = vpop.f32.mrb[1].mxu0 }
  0xdd   :  { %v109_v15 = vadd.f32 %v226_v11, %v108_v14 }
  0xde   :  { %v120_v16 = vmul.f32 0.01, %v114_v13  ;;  %vm118_vm6 = vcmp.ge.f32.partialorder %v114_v13, 0.0 }
  0xdf   :  { %vm117_vm7 = vcmp.ge.f32.partialorder %v109_v15, 0.0  ;;  %v119_v17 = vmul.f32 0.01, %v109_v15 }
  0xe0   :  { %v122_v19 = vsel %vm118_vm6, %v114_v13, %v120_v16 }
  0xe1   :  { %v121_v18 = vsel %vm117_vm7, %v109_v15, %v119_v17 }
  0xe2   :  { %259 = vmatprep.mubr.msk.f32.mxu1 %vm134_vm8, %v121_v18 }
  0xe3   :  { %260 = vmatmul.mubr.msk.f32.vlgmr.msra.gmra.mrb[0].mxu1 %vm134_vm8, %v122_v19 }
 0x1b6   :  { %v261_v21 = vpop.f32.mrb[0].mxu1 }
 0x1b7   :  { %v217_v22 = vadd.f32 %v261_v21, %v230_v20  ;;  %v211_v23 = vpop.f32.mrb[1].mxu1 }
 0x1b8   :  { %v212_v24 = vadd.f32 %v230_v20, %v211_v23 }
 0x1b9   :  { %221 = vst [vmem:[%s353_s5 + $0x8] sm:$0xff] %v217_v22 }
 0x1ba   :  { %220 = vst [vmem:[%s353_s5] sm:$0xff] %v212_v24 }

// kernel: _lambda_.5
= control target key start
LH: loop header
LB: loop body
LE: loop exit
PB: predicated region body
PF: predicated region fallthrough
CT: control target
= control target key end

     0   :  { %s624_s18 = smov 0   ;;  %s684_s0 = inlined_call_operand.vmem [shape: bf16[32,32], index: 0, kind: input, shape index: {}]   ;;  %s685_s1 = inlined_call_operand.vmem [shape: bf16[32,128], index: 1, kind: input, shape index: {}]   ;;  %s686_s2 = inlined_call_operand.vmem [shape: f32[1,128], index: 2, kind: input, shape index: {}]   ;;  %s687_s3 = inlined_call_operand.vmem [shape: bf16[128,128], index: 3, kind: input, shape index: {}]   ;;  %s688_s4 = inlined_call_operand.vmem [shape: f32[1,128], index: 4, kind: input, shape index: {}]   ;;  %s689_s5 = inlined_call_operand.vmem [shape: bf16[32,128], index: 5, kind: output, shape index: {}]  }
   0x1 LB: > { %s489_s19 = sadd.s32 4294967295, %s590_s18   ;;  %p493_p0 = scmp.ge.s32.totalorder %s590_s18, 1  ;;  %s590_s18 = sphi %s624_s18, %s15_s18  }
   0x2   : > { %p188_p1 = scmp.lt.s32.totalorder %s590_s18, 3 }
   0x4   : > { %p189_p2 = pnand %p493_p0, %p188_p1 }
   0x5   : > { %v573_v0 = vld [vmem:[%s685_s1] sm:$0xff] (!%p189_p2)   ;;  %v592_v1 = vmov (!%p189_p2), 0.0   ;;  %v574_v2 = vld [vmem:[%s685_s1 + $0x8] sm:$0xff] (!%p189_p2)   ;;  %vm593_vm0 = vmmov (!%p189_p2), 0   ;;  %s494_s24 = sshll.u32 (!%p189_p2), %s489_s19, 1  ;;  %vm259_vm1 = vcmask (!%p189_p2), 261120  }
   0x6   : > { %192 = sbr.rel (%p189_p2) target bundleno = 457 (0x1c9), region = 40  ;;  %535 = vmatprep.subr.bf16.mxu0 (!%p189_p2), %v592_v1  ;;  %543 = vmatprep.subr.bf16.mxu1 (!%p189_p2), %v592_v1  ;;  %p217_p3 = scmp.lt.s32.totalorder (!%p189_p2), %s494_s24, 3  ;;  %v576_v3 = vld [vmem:[%s687_s3] sm:$0xff] (!%p189_p2)   ;;  %v577_v4 = vld [vmem:[%s687_s3 + $0x8] sm:$0xff] (!%p189_p2)   ;;  %v578_v5 = vld [vmem:[%s687_s3 + $0x10] sm:$0xff] (!%p189_p2)  }
   0x7   : > { %536 = vmatpush3.bf16.msra.mxu0 (!%p189_p2), %v573_v0  ;;  %539 = vmatprep.mubr.msk.bf16.mxu0 (!%p189_p2), %vm593_vm0, %v592_v1  ;;  %v579_v7 = vld [vmem:[%s687_s3 + $0x18] sm:$0xff] (!%p189_p2)   ;;  %v580_v8 = vld [vmem:[%s687_s3 + $0x20] sm:$0xff] (!%p189_p2)   ;;  %v581_v9 = vld [vmem:[%s687_s3 + $0x28] sm:$0xff] (!%p189_p2)  }
   0x8   : > { %537 = vmatprep.subr.bf16.mxu0 (!%p189_p2), %v592_v1  ;;  %559 = vmatprep.mubr.msk.bf16.mxu1 (!%p189_p2), %vm593_vm0, %v592_v1  ;;  %v582_v10 = vld [vmem:[%s687_s3 + $0x30] sm:$0xff] (!%p189_p2)   ;;  %v583_v11 = vld [vmem:[%s687_s3 + $0x38] sm:$0xff] (!%p189_p2)   ;;  %v498_v12 = vld [vmem:[%s686_s2] ss:$0 sm:$0xff] (!%p189_p2) }
   0x9   : > { %544 = vmatpush3.bf16.msra.mxu1 (!%p189_p2), %v576_v3  ;;  %v503_v24 = vld [vmem:[%s688_s4] ss:$0 sm:$0xff] (!%p189_p2) }
   0xa   : > { %545 = vmatprep.subr.bf16.mxu1 (!%p189_p2), %v592_v1 }
   0xb   : > { %538 = vmatpush3.bf16.msra.mxu0 (!%p189_p2), %v574_v2 }
   0xd   : > { %s691_s24 = smov (!%p217_p3, %s494_s24), 3  ;;  %546 = vmatpush3.bf16.msra.mxu1 %v577_v4 }
   0xe   : > { %s495_s29 = sshll.u32 %s691_s24, 2  ;;  %547 = vmatprep.subr.bf16.mxu1 %v592_v1 }
   0xf   : > { %s220_s7 = scalar_lea.vmem %s684_s0, %s495_s29  ;;  %s226_s28 = scalar_lea.vmem %s689_s5, %s495_s29 }
  0x10   : > { %v575_v6 = vld [vmem:[%s220_s7] sm:$0xff]  }
  0x11   : > { %540 = vmatmul.mubr.msk.bf16.vlgmr.msra.gmra.mrb[0].mxu0 %vm259_vm1, %v575_v6  ;;  %548 = vmatpush3.bf16.msra.mxu1 %v578_v5 }
  0x12   : > { %549 = vmatprep.subr.bf16.mxu1 %v592_v1 }
  0x15   : > { %550 = vmatpush3.bf16.msra.mxu1 %v579_v7 }
  0x16   : > { %551 = vmatprep.subr.bf16.mxu1 %v592_v1 }
  0x19   : > { %552 = vmatpush3.bf16.msra.mxu1 %v580_v8 }
  0x1a   : > { %553 = vmatprep.subr.bf16.mxu1 %v592_v1 }
  0x1d   : > { %554 = vmatpush3.bf16.msra.mxu1 %v581_v9 }
  0x1e   : > { %555 = vmatprep.subr.bf16.mxu1 %v592_v1 }
  0x21   : > { %556 = vmatpush3.bf16.msra.mxu1 %v582_v10 }
  0x22   : > { %557 = vmatprep.subr.bf16.mxu1 %v592_v1 }
  0x25   : > { %558 = vmatpush3.bf16.msra.mxu1 %v583_v11 }
  0xe4   : > { %v297_v13 = vpop.f32.mrb[0].mxu0 }
  0xe5   : > { %v298_v14 = vadd.f32 %v498_v12, %v297_v13  ;;  %v541_v15 = vpop.f32.mrb[1].mxu0 }
  0xe6   : > { %v300_v16 = vpop.f32.mrb[2].mxu0 }
  0xe7   : > { %v306_v17 = vmul.f32 0.01, %v298_v14  ;;  %v301_v18 = vadd.f32 %v498_v12, %v300_v16  ;;  %v542_v19 = vpop.f32.mrb[3].mxu0  ;;  %vm304_vm2 = vcmp.ge.f32.partialorder %v298_v14, 0.0 }
  0xe9   : > { %vm305_vm3 = vcmp.ge.f32.partialorder %v301_v18, 0.0  ;;  %v307_v20 = vmul.f32 0.01, %v301_v18  ;;  %v308_v21 = vsel %vm304_vm2, %v298_v14, %v306_v17 }
  0xeb   : > { %v309_v22 = vsel %vm305_vm3, %v301_v18, %v307_v20 }
  0xec   : > { %v310_v23 = vpack.c.bf16 %v309_v22, %v308_v21 }
  0xee   : > { %560 = vmatmul.mubr.bf16.vlgmr.msra.gmra.mrb[0].mxu1 %v310_v23 }
 0x1c1   : > { %v416_v25 = vpop.f32.mrb[0].mxu1 }
 0x1c2   : > { %v561_v26 = vpop.f32.mrb[1].mxu1  ;;  %v417_v28 = vadd.f32 %v503_v24, %v416_v25 }
 0x1c3   : > { %v419_v27 = vpop.f32.mrb[2].mxu1 }
 0x1c4   : > { %v420_v29 = vadd.f32 %v503_v24, %v419_v27  ;;  %v562_v30 = vpop.f32.mrb[3].mxu1 }
 0x1c6   : > { %v521_v31 = vpack.c.bf16 %v420_v29, %v417_v28 }
 0x1c8   : > { %522 = vst [vmem:[%s226_s28] sm:$0xff] %v521_v31  }
 0x1c9 PF: > { %s15_s18 = sadd.s32 1, %s590_s18  }
 0x1ca   : > { %p12_p4 = scmp.ge.s32.totalorder %s15_s18, 4  }
 0x1cc   :  { %14 = sbr.rel (!%p12_p4) target bundleno = 1 (0x1), region = 70 }

// kernel: _lambda_.7
= control target key start
LH: loop header
LB: loop body
LE: loop exit
PB: predicated region body
PF: predicated region fallthrough
CT: control target
= control target key end

     0   :  { %s860_s21 = smov 120   ;;  %s861_s22 = smov 104   ;;  %vm96_vm0 = vcmask 130048   ;;  %vm40_vm1 = vcmask 64512   ;;  %v867_v57 = vmov 0.0   ;;  %s1180_s0 = inlined_call_operand.vmem [shape: f32[16,128], index: 0, kind: input, shape index: {}]   ;;  %s1181_s4 = inlined_call_operand.vmem [shape: f32[1,16], index: 4, kind: input, shape index: {}]   ;;  %s1182_s3 = inlined_call_operand.vmem [shape: f32[1,16], index: 3, kind: input, shape index: {}]   ;;  %s1183_s6 = inlined_call_operand.vmem [shape: f32[16,256], index: 6, kind: input, shape index: {}]   ;;  %s1184_s5 = inlined_call_operand.vmem [shape: f32[8,256], index: 5, kind: input, shape index: {}]   ;;  %s1185_s9 = inlined_call_operand.vmem [shape: f32[256,128], index: 9, kind: input, shape index: {}]   ;;  %s1186_s7 = inlined_call_operand.vmem [shape: f32[16,256], index: 7, kind: input, shape index: {}]   ;;  %s1187_s1 = inlined_call_operand.vmem [shape: f32[1,8], index: 1, kind: input, shape index: {}]   ;;  %s1188_s2 = inlined_call_operand.vmem [shape: f32[1,8], index: 2, kind: input, shape index: {}]   ;;  %s1189_s8 = inlined_call_operand.vmem [shape: f32[1,256], index: 8, kind: input, shape index: {}]   ;;  %s1190_s10 = inlined_call_operand.vmem [shape: f32[1,128], index: 10, kind: input, shape index: {}]   ;;  %s1191_s11 = inlined_call_operand.vmem [shape: f32[16,128], index: 11, kind: output, shape index: {}]  }
   0x1   :  { %v941_v0 = vld [vmem:[%s1180_s0] sm:$0xff]  ;;  %v946_v1 = vld [vmem:[%s1180_s0 + $0x8] sm:$0xff]  ;;  %s862_s0 = smov 24   ;;  %s863_s25 = smov 96   ;;  %v200_v55 = vld [vmem:[%s1183_s6 + $0x18] sm:$0xff]  ;;  %275 = vmatprep.mubr.f32.mxu0 %v867_v57 }
   0x2   :  { %v86_v2 = vmul.f32 %v941_v0, %v941_v0  ;;  %v87_v3 = vmul.f32 %v946_v1, %v946_v1  ;;  %v736_v4 = vld [vmem:[%s1181_s4] ss:$0 sm:$0xff]  ;;  %s864_s4 = smov 112   ;;  %v41_v13 = vsel %vm40_vm1, %v941_v0, 0.0  ;;  %v44_v14 = vsel %vm40_vm1, %v946_v1, 0.0  ;;  %s865_s28 = smov 8  }
   0x3   :  { %v735_v15 = vld [vmem:[%s1182_s3] ss:$0 sm:$0xff]  ;;  %s866_s29 = smov 80   ;;  %v198_v54 = vld [vmem:[%s1183_s6 + $0x8] sm:$0xff]  ;;  %v199_v59 = vld [vmem:[%s1183_s6 + $0x10] sm:$0xff]  ;;  %s870_s26 = smov 72  }
   0x4   :  { %90 = vrot.lane.b32.xlu0 %v86_v2, %s860_s21  ;;  %92 = vrot.lane.b32.xlu1 %v87_v3, %s860_s21  ;;  %v197_v56 = vld [vmem:[%s1183_s6] sm:$0xff]  ;;  %v782_v58 = vpack.c.bf16 %v200_v55, %v198_v54  ;;  %v196_v62 = vld [vmem:[%s1184_s5 + $0x8] sm:$0xff]  ;;  %s871_s27 = smov 88   ;;  %s875_s30 = smov 127  }
   0x5   :  { %v784_v60 = vpack.c.bf16 %v199_v59, %v197_v56  ;;  %s876_s12 = smov 55  }
   0x6   :  { %783 = vmatprep.subr.bf16.mxu0 %v782_v58 }
   0x7   :  { %785 = vmatpush1.bf16.msra.mxu0 %v784_v60  ;;  %v372_v60 = vld [vmem:[%s1186_s7 + $0x8] sm:$0xff] }
   0x8   :  { %103 = vrot.lane.b32.xlu0 %v86_v2, %s861_s22  ;;  %105 = vrot.lane.b32.xlu1 %v87_v3, %s861_s22 }
   0x9   :  { %294 = vmatprep.subr.mxu0 %v196_v62 }
   0xc   :  { %142 = vrot.lane.b32.xlu1 %v736_v4, %s862_s0  ;;  %149 = vrot.lane.b32.xlu0 %v941_v0, %s863_s25 }
  0x76   :  { %v91_v5 = vpop.permute.xlu0 %90  ;;  %v93_v6 = vpop.permute.xlu1 %92 }
  0x77   :  { %v97_v7 = vsel %vm96_vm0, %v91_v5, 0.0  ;;  %v100_v8 = vsel %vm96_vm0, %v93_v6, 0.0 }
  0x78   :  { %98 = vadd.xlane.f32.xlu0 %v97_v7 }
  0x7a   :  { %v104_v9 = vpop.permute.xlu0 %103  ;;  %v106_v10 = vpop.permute.xlu1 %105 }
  0x7b   :  { %v109_v11 = vsel %vm96_vm0, %v104_v9, 0.0  ;;  %v112_v12 = vsel %vm96_vm0, %v106_v10, 0.0  ;;  %v510_v10 = vld [vmem:[%s1185_s9 + $0x80] sm:$0xff] }
  0x7c   :  { %101 = vadd.xlane.f32.xlu0 %v100_v8  ;;  %110 = vadd.xlane.f32.xlu1 %v109_v11  ;;  %v511_v11 = vld [vmem:[%s1185_s9 + $0x88] sm:$0xff] }
  0x7e   :  { %v150_v16 = vpop.permute.xlu0 %149  ;;  %v143_v17 = vpop.permute.xlu1 %142 }
  0x80   :  { %113 = vadd.xlane.f32.xlu0 %v112_v12  ;;  %v494_v12 = vld [vmem:[%s1185_s9] sm:$0xff] }
  0x8d   :  { %151 = vrot.lane.b32.xlu1 %v946_v1, %s863_s25  ;;  %s868_s25 = smov 89  }
  0x96   :  { %177 = vrot.lane.b32.xlu0 %v941_v0, %s864_s4 }
  0xb1   :  { %42 = vadd.xlane.f32.xlu1 %v41_v13  ;;  %v790_v13 = vpack.c.bf16 %v511_v11, %v510_v10 }
  0xb3   :  { %791 = vmatprep.subr.bf16.mxu1 %v790_v13 }
  0xb5   :  { %45 = vadd.xlane.f32.xlu0 %v44_v14  ;;  %v495_v14 = vld [vmem:[%s1185_s9 + $0x8] sm:$0xff] }
  0xc2   :  { %179 = vrot.lane.b32.xlu1 %v946_v1, %s864_s4 }
  0xcb   :  { %131 = vrot.lane.b32.xlu0 %v735_v15, %s865_s28  ;;  %v512_v15 = vld [vmem:[%s1185_s9 + $0x90] sm:$0xff] }
  0xcf   :  { %169 = vrot.lane.b32.xlu0 %v941_v0, %s866_s29 }
  0xd3   :  { %171 = vrot.lane.b32.xlu0 %v946_v1, %s866_s29 }
 0x105   :  { %v99_v18 = vpop.xlane.xlu0 %98 }
 0x109   :  { %v111_v19 = vpop.xlane.xlu1 %110  ;;  %v102_v20 = vpop.xlane.xlu0 %101 }
 0x10a   :  { %v115_v21 = vadd.f32 %v111_v19, %v99_v18  ;;  %v496_v19 = vld [vmem:[%s1185_s9 + $0x10] sm:$0xff] }
 0x10c   :  { %v117_v22 = vmul.f32 0.03125, %v115_v21  ;;  %v514_v21 = vld [vmem:[%s1185_s9 + $0xa0] sm:$0xff] }
 0x10d   :  { %v114_v23 = vpop.xlane.xlu0 %113  ;;  %v152_v35 = vpop.permute.xlu1 %151 }
 0x10e   :  { %v119_v24 = vadd.f32 1e-05, %v117_v22  ;;  %v116_v25 = vadd.f32 %v114_v23, %v102_v20  ;;  %v497_v20 = vld [vmem:[%s1185_s9 + $0x18] sm:$0xff]  ;;  %v515_v22 = vld [vmem:[%s1185_s9 + $0xa8] sm:$0xff] }
 0x10f   :  { %v796_v23 = vpack.c.bf16 %v497_v20, %v496_v19  ;;  %v506_v19 = vld [vmem:[%s1185_s9 + $0x60] sm:$0xff] }
 0x110   :  { %852 = vrsqrt.f32 %v119_v24  ;;  %v118_v26 = vmul.f32 0.03125, %v116_v25  ;;  %v798_v25 = vpack.c.bf16 %v515_v22, %v514_v21  ;;  %v524_v21 = vld [vmem:[%s1185_s9 + $0xf0] sm:$0xff]  ;;  %v525_v22 = vld [vmem:[%s1185_s9 + $0xf8] sm:$0xff] }
 0x111   :  { %v178_v37 = vpop.permute.xlu0 %177 }
 0x112   :  { %v120_v27 = vadd.f32 1e-05, %v118_v26  ;;  %v498_v26 = vld [vmem:[%s1185_s9 + $0x20] sm:$0xff] }
 0x114   :  { %854 = vrsqrt.f32 %v120_v27  ;;  %v499_v27 = vld [vmem:[%s1185_s9 + $0x28] sm:$0xff] }
 0x11a   :  { %v853_v28 = vpop.eup %852 }
 0x11b   :  { %v123_v29 = vmul.f32 %v853_v28, %v941_v0  ;;  %v516_v28 = vld [vmem:[%s1185_s9 + $0xb0] sm:$0xff] }
 0x11d   :  { %v145_v30 = vmul.f32 %v143_v17, %v123_v29 }
 0x11e   :  { %v855_v31 = vpop.eup %854 }
 0x11f   :  { %v157_v32 = vmul.f32 %v150_v16, %v145_v30  ;;  %v124_v33 = vmul.f32 %v855_v31, %v946_v1  ;;  %v183_v38 = vmul.f32 %v178_v37, %v145_v30  ;;  %v800_v31 = vpack.c.bf16 %v499_v27, %v498_v26  ;;  %v518_v37 = vld [vmem:[%s1185_s9 + $0xc0] sm:$0xff] }
 0x120   :  { %v468_v27 = vlaneseq }
 0x121   :  { %161 = vrot.lane.b32.xlu1 %v157_v32, %s864_s4  ;;  %v146_v34 = vmul.f32 %v143_v17, %v124_v33  ;;  %v792_v17 = vpack.c.bf16 %v495_v14, %v494_v12 }
 0x123   :  { %v158_v36 = vmul.f32 %v152_v35, %v146_v34  ;;  %793 = vmatpush3.bf16.msra.mxu1 %v792_v17  ;;  %v523_v17 = vld [vmem:[%s1185_s9 + $0xe8] sm:$0xff] }
 0x125   :  { %163 = vrot.lane.b32.xlu1 %v158_v36, %s864_s4 }
 0x129   :  { %187 = vrot.lane.b32.xlu1 %v183_v38, %s864_s4  ;;  %v519_v38 = vld [vmem:[%s1185_s9 + $0xc8] sm:$0xff] }
 0x13e   :  { %v43_v39 = vpop.xlane.xlu1 %42 }
 0x13f   :  { %v48_v40 = vmul.f32 0.125, %v43_v39 }
 0x141   :  { %v982_v41 = vsub.f32 %v941_v0, %v48_v40  ;;  %v806_v40 = vpack.c.bf16 %v519_v38, %v518_v37 }
 0x142   :  { %v46_v42 = vpop.xlane.xlu0 %45  ;;  %v180_v43 = vpop.permute.xlu1 %179 }
 0x143   :  { %v184_v44 = vmul.f32 %v180_v43, %v146_v34  ;;  %v52_v45 = vmul.f32 %v982_v41, %v982_v41  ;;  %v49_v50 = vmul.f32 0.125, %v46_v42  ;;  %v500_v34 = vld [vmem:[%s1185_s9 + $0x30] sm:$0xff]  ;;  %v502_v42 = vld [vmem:[%s1185_s9 + $0x40] sm:$0xff]  ;;  %v503_v43 = vld [vmem:[%s1185_s9 + $0x48] sm:$0xff] }
 0x145   :  { %189 = vrot.lane.b32.xlu1 %v184_v44, %s864_s4  ;;  %v54_v46 = vsel %vm40_vm1, %v52_v45, 0.0  ;;  %v989_v51 = vsub.f32 %v946_v1, %v49_v50  ;;  %v520_v44 = vld [vmem:[%s1185_s9 + $0xd0] sm:$0xff]  ;;  %v521_v45 = vld [vmem:[%s1185_s9 + $0xd8] sm:$0xff]  ;;  %s869_s4 = smov 73  }
 0x146   :  { %v132_v47 = vpop.permute.xlu0 %131  ;;  %55 = vadd.xlane.f32.xlu0 %v54_v46  ;;  %v808_v46 = vpack.c.bf16 %v503_v43, %v502_v42 }
 0x147   :  { %v135_v48 = vmul.f32 %v132_v47, %v124_v33  ;;  %v53_v52 = vmul.f32 %v989_v51, %v989_v51  ;;  %v134_v61 = vmul.f32 %v132_v47, %v123_v29  ;;  %v517_v29 = vld [vmem:[%s1185_s9 + $0xb8] sm:$0xff]  ;;  %v810_v47 = vpack.c.bf16 %v521_v45, %v520_v44 }
 0x148   :  { %v802_v33 = vpack.c.bf16 %v517_v29, %v516_v28  ;;  %v469_v28 = vshrl.u32 %v468_v27, 7 }
 0x149   :  { %v156_v49 = vmul.f32 %v152_v35, %v135_v48  ;;  %v57_v53 = vsel %vm40_vm1, %v53_v52, 0.0  ;;  %v155_v63 = vmul.f32 %v150_v16, %v134_v61  ;;  %v513_v16 = vld [vmem:[%s1185_s9 + $0x98] sm:$0xff] }
 0x14a   :  { %v170_v4 = vpop.permute.xlu0 %169  ;;  %v794_v18 = vpack.c.bf16 %v513_v16, %v512_v15  ;;  %v501_v35 = vld [vmem:[%s1185_s9 + $0x38] sm:$0xff]  ;;  %v522_v16 = vld [vmem:[%s1185_s9 + $0xe0] sm:$0xff]  ;;  %v470_v29 = vsub.s32 0, %v469_v28 }
 0x14b   :  { %v175_v7 = vmul.f32 %v170_v4, %v134_v61  ;;  %v804_v39 = vpack.c.bf16 %v501_v35, %v500_v34  ;;  %v374_v61 = vld [vmem:[%s1186_s7 + $0x18] sm:$0xff]  ;;  %v733_v4 = vld [vmem:[%s1187_s1] ss:$0 sm:$0xff] }
 0x14c   :  { %795 = vmatprep.subr.bf16.mxu1 %v794_v18  ;;  %v814_v18 = vpack.c.bf16 %v523_v17, %v522_v16 }
 0x14d   :  { %797 = vmatpush3.bf16.msra.mxu1 %v796_v23  ;;  %v818_v23 = vpack.c.bf16 %v525_v22, %v524_v21 }
 0x14e   :  { %v172_v24 = vpop.permute.xlu0 %171  ;;  %799 = vmatprep.subr.bf16.mxu1 %v798_v25  ;;  %v509_v25 = vld [vmem:[%s1185_s9 + $0x78] sm:$0xff] }
 0x14f   :  { %v176_v30 = vmul.f32 %v172_v24, %v135_v48  ;;  %v504_v48 = vld [vmem:[%s1185_s9 + $0x50] sm:$0xff] }
 0x150   :  { %v508_v24 = vld [vmem:[%s1185_s9 + $0x70] sm:$0xff] }
 0x151   :  { %801 = vmatpush3.bf16.msra.mxu1 %v800_v31  ;;  %v820_v26 = vpack.c.bf16 %v509_v25, %v508_v24  ;;  %v474_v31 = vsub.s32 1, %v469_v28 }
 0x152   :  { %803 = vmatprep.subr.bf16.mxu1 %v802_v33 }
 0x155   :  { %805 = vmatpush3.bf16.msra.mxu1 %v804_v39 }
 0x156   :  { %807 = vmatprep.subr.bf16.mxu1 %v806_v40 }
 0x159   :  { %809 = vmatpush3.bf16.msra.mxu1 %v808_v46 }
 0x15a   :  { %811 = vmatprep.subr.bf16.mxu1 %v810_v47 }
 0x169   :  { %58 = vadd.xlane.f32.xlu1 %v57_v53 }
 0x193   :  { %v162_v2 = vpop.permute.xlu1 %161 }
 0x194   :  { %v167_v3 = vsub.f32 %v155_v63, %v162_v2  ;;  %v195_v63 = vld [vmem:[%s1184_s5] sm:$0xff]  ;;  %v786_v2 = vpack.c.bf16 %v374_v61, %v372_v60 }
 0x196   :  { %203 = vrot.lane.b32.xlu0 %v167_v3, %s860_s21 }
 0x197   :  { %v164_v5 = vpop.permute.xlu1 %163 }
 0x198   :  { %v168_v6 = vsub.f32 %v156_v49, %v164_v5  ;;  %v505_v49 = vld [vmem:[%s1185_s9 + $0x58] sm:$0xff] }
 0x199   :  { %v812_v50 = vpack.c.bf16 %v505_v49, %v504_v48 }
 0x19a   :  { %205 = vrot.lane.b32.xlu1 %v168_v6, %s860_s21 }
 0x19b   :  { %v188_v8 = vpop.permute.xlu1 %187  ;;  %813 = vmatpush3.bf16.msra.mxu1 %v812_v50 }
 0x19c   :  { %v193_v9 = vadd.f32 %v188_v8, %v175_v7  ;;  %v373_v8 = vld [vmem:[%s1186_s7 + $0x10] sm:$0xff]  ;;  %815 = vmatprep.subr.bf16.mxu1 %v814_v18 }
 0x19e   :  { %377 = vrot.lane.b32.xlu0 %v193_v9, %s860_s21  ;;  %v734_v9 = vld [vmem:[%s1188_s2] ss:$0 sm:$0xff] }
 0x1a2   :  { %652 = vrot.lane.b32.xlu0 %v941_v0, %s868_s25 }
 0x1a6   :  { %616 = vrot.lane.b32.xlu0 %v941_v0, %s869_s4 }
 0x1aa   :  { %644 = vrot.lane.b32.xlu0 %v941_v0, %s870_s26 }
 0x1ae   :  { %608 = vrot.lane.b32.xlu0 %v941_v0, %s871_s27 }
 0x1b7   :  { %v190_v32 = vpop.permute.xlu1 %189 }
 0x1b8   :  { %v194_v36 = vadd.f32 %v190_v32, %v176_v30  ;;  %v466_v30 = vld [vmem:[%s1189_s8] sm:$0x3]  ;;  %s873_s8 = smov 54  }
 0x1b9   :  { %v471_v32 = vrot.slane %v466_v30, %v470_v29  ;;  %v475_v33 = vrot.slane %v466_v30, %v474_v31 }
 0x1ba   :  { %379 = vrot.lane.b32.xlu1 %v194_v36, %s860_s21 }
 0x1be   :  { %654 = vrot.lane.b32.xlu1 %v946_v1, %s868_s25 }
 0x1c2   :  { %618 = vrot.lane.b32.xlu1 %v946_v1, %s869_s4 }
 0x1c6   :  { %646 = vrot.lane.b32.xlu1 %v946_v1, %s870_s26 }
 0x1ca   :  { %610 = vrot.lane.b32.xlu1 %v946_v1, %s871_s27 }
 0x1d3   :  { %v56_v52 = vpop.xlane.xlu0 %55 }
 0x1d4   :  { %v60_v53 = vmul.f32 0.125, %v56_v52  ;;  %v874_v52 = vmov 2  }
 0x1d5   :  { %848 = vset.pattern.permute.xlu0 %v874_v52  ;;  %849 = vset.pattern.permute.xlu1 %v874_v52 }
 0x1d6   :  { %v62_v54 = vadd.f32 1e-05, %v60_v53 }
 0x1d8   :  { %856 = vrsqrt.f32 %v62_v54 }
 0x1e2   :  { %v857_v59 = vpop.eup %856 }
 0x1e3   :  { %v66_v62 = vmul.f32 %v857_v59, %v982_v41  ;;  %v371_v41 = vld [vmem:[%s1186_s7] sm:$0xff] }
 0x1e4   :  { %v788_v11 = vpack.c.bf16 %v373_v8, %v371_v41 }
 0x1e5   :  { %v75_v6 = vmul.f32 %v733_v4, %v66_v62 }
 0x1f6   :  { %v59_v55 = vpop.xlane.xlu1 %58 }
 0x1f7   :  { %v61_v56 = vmul.f32 0.125, %v59_v55 }
 0x1f9   :  { %v63_v58 = vadd.f32 1e-05, %v61_v56  ;;  %v743_v56 = vld [vmem:[%s1190_s10] ss:$0 sm:$0xff] }
 0x1fb   :  { %858 = vrsqrt.f32 %v63_v58 }
 0x205   :  { %v859_v3 = vpop.eup %858 }
 0x206   :  { %v67_v7 = vmul.f32 %v859_v3, %v989_v51  ;;  %v84_v51 = vadd.f32 %v734_v9, %v75_v6 }
 0x208   :  { %v204_v5 = vpop.permute.xlu0 %203  ;;  %v76_v12 = vmul.f32 %v733_v4, %v67_v7 }
 0x209   :  { %737 = vmatmul.mubr.msk.f32.vlgmr.msra.gmra.mrb[0].mxu0 %vm96_vm0, %v204_v5 }
 0x20a   :  { %281 = vmatprep.mubr.f32.mxu0 %v867_v57  ;;  %295 = vmatpush1.msra.mxu0 %v195_v63  ;;  %v85_v13 = vadd.f32 %v734_v9, %v76_v12 }
 0x20b   :  { %787 = vmatprep.subr.bf16.mxu0 %v786_v2 }
 0x20c   :  { %v206_v10 = vpop.permute.xlu1 %205 }
 0x20d   :  { %738 = vmatmul.mubr.msk.f32.gmra.mrb[2].mxu0 %vm96_vm0, %v206_v10 }
 0x20e   :  { %358 = vmatprep.mubr.f32.mxu0 %v867_v57 }
 0x210   :  { %v378_v14 = vpop.permute.xlu0 %377 }
 0x211   :  { %739 = vmatmul.mubr.msk.f32.vlgmr.msra.gmra.mrb[0].mxu0 %vm40_vm1, %v84_v51 }
 0x212   :  { %364 = vmatprep.mubr.f32.mxu0 %v867_v57  ;;  %789 = vmatpush1.bf16.msra.mxu0 %v788_v11  ;;  %v877_v11 = vmov 0  }
 0x214   :  { %v653_v53 = vpop.permute.xlu0 %652 }
 0x215   :  { %740 = vmatmul.mubr.msk.f32.gmra.mrb[2].mxu0 %vm40_vm1, %v85_v13 }
 0x216   :  { %449 = vmatprep.mubr.f32.mxu0 %v867_v57 }
 0x218   :  { %v617_v54 = vpop.permute.xlu0 %616 }
 0x219   :  { %741 = vmatmul.mubr.msk.f32.vlgmr.msra.gmra.mrb[0].mxu0 %vm96_vm0, %v378_v14 }
 0x21a   :  { %455 = vmatprep.mubr.f32.mxu0 %v867_v57  ;;  %v507_v57 = vld [vmem:[%s1185_s9 + $0x68] sm:$0xff]  ;;  %s872_s9 = smov 58  }
 0x21b   :  { %v816_v20 = vpack.c.bf16 %v507_v57, %v506_v19  ;;  %678 = vrot.lane.b32.xlu0 %v941_v0, %s872_s9  ;;  %680 = vrot.lane.b32.xlu1 %v946_v1, %s872_s9 }
 0x21c   :  { %v645_v60 = vpop.permute.xlu0 %644 }
 0x21d   :  { %817 = vmatpush3.bf16.msra.mxu1 %v816_v20 }
 0x21e   :  { %819 = vmatprep.subr.bf16.mxu1 %v818_v23 }
 0x21f   :  { %670 = vrot.lane.b32.xlu0 %v941_v0, %s873_s8  ;;  %672 = vrot.lane.b32.xlu1 %v946_v1, %s873_s8 }
 0x220   :  { %v609_v63 = vpop.permute.xlu0 %608 }
 0x221   :  { %821 = vmatpush3.bf16.msra.mxu1 %v820_v26 }
 0x22c   :  { %v380_v15 = vpop.permute.xlu1 %379 }
 0x22d   :  { %742 = vmatmul.mubr.msk.f32.gmra.mrb[2].mxu0 %vm96_vm0, %v380_v15 }
 0x230   :  { %v655_v3 = vpop.permute.xlu1 %654 }
 0x234   :  { %v619_v5 = vpop.permute.xlu1 %618 }
 0x238   :  { %v647_v9 = vpop.permute.xlu1 %646 }
 0x23c   :  { %v611_v12 = vpop.permute.xlu1 %610 }
 0x28d   :  { %v679_v4 = vpop.permute.xlu0 %678  ;;  %v681_v14 = vpop.permute.xlu1 %680 }
 0x291   :  { %v671_v15 = vpop.permute.xlu0 %670  ;;  %v673_v25 = vpop.permute.xlu1 %672 }
 0x2ec   :  { %v451_v34 = vpop.f32.mrb[0].mxu0 }
 0x2ed   :  { %v478_v35 = vadd.f32 %v471_v32, %v451_v34  ;;  %v453_v36 = vpop.f32.mrb[1].mxu0 }
 0x2ee   :  { %v479_v37 = vadd.f32 %v475_v33, %v453_v36  ;;  %v687_v36 = vand.u32 127, %v468_v27 }
 0x2ef   :  { %v486_v38 = vmul.f32 0.01, %v478_v35  ;;  %vm482_vm3 = vcmp.ge.f32.partialorder %v478_v35, 0.0 }
 0x2f0   :  { %vm483_vm2 = vcmp.ge.f32.partialorder %v479_v37, 0.0  ;;  %v487_v39 = vmul.f32 0.01, %v479_v37  ;;  %vm690_vm6 = vcmp.eq.s32.totalorder %v687_v36, 2  ;;  %vm689_vm7 = vcmp.eq.s32.totalorder %v687_v36, 1 }
 0x2f1   :  { %v490_v42 = vsel %vm482_vm3, %v478_v35, %v486_v38  ;;  %vm688_vm8 = vcmp.eq.s32.totalorder %v687_v36, 0 }
 0x2f2   :  { %v491_v40 = vsel %vm483_vm2, %v479_v37, %v487_v39 }
 0x2f3   :  { %597 = vmatprep.mubr.f32.mxu1 %v491_v40 }
 0x2f4   :  { %598 = vmatmul.mubr.f32.vlgmr.msra.gmra.mrb[0].mxu1 %v490_v42 }
 0x300   :  { %v457_v43 = vpop.f32.mrb[2].mxu0 }
 0x301   :  { %v480_v44 = vadd.f32 %v471_v32, %v457_v43  ;;  %v459_v45 = vpop.f32.mrb[3].mxu0 }
 0x302   :  { %v481_v46 = vadd.f32 %v475_v33, %v459_v45 }
 0x303   :  { %v488_v47 = vmul.f32 0.01, %v480_v44  ;;  %vm484_vm5 = vcmp.ge.f32.partialorder %v480_v44, 0.0 }
 0x304   :  { %v489_v48 = vmul.f32 0.01, %v481_v46  ;;  %vm485_vm4 = vcmp.ge.f32.partialorder %v481_v46, 0.0 }
 0x305   :  { %v492_v50 = vsel %vm484_vm5, %v480_v44, %v488_v47 }
 0x306   :  { %v493_v49 = vsel %vm485_vm4, %v481_v46, %v489_v48 }
 0x307   :  { %602 = vmatprep.mubr.f32.mxu1 %v493_v49 }
 0x308   :  { %603 = vmatmul.mubr.f32.gmra.mrb[2].mxu1 %v492_v50 }
 0x3c7   :  { %v776_v55 = vpop.f32.mrb[0].mxu1 }
 0x3c8   :  { %v777_v58 = vpop.f32.mrb[1].mxu1 }
 0x3c9   :  { %v778_v59 = vadd.f32 %v777_v58, %v776_v55 }
 0x3cb   :  { %v1163_v61 = vadd.f32 %v778_v59, %v743_v56 }
 0x3cd   :  { %v658_v62 = vmul.f32 %v653_v53, %v1163_v61  ;;  %v622_v2 = vmul.f32 %v617_v54, %v1163_v61  ;;  %v684_v6 = vadd.f32 %v679_v4, %v1163_v61  ;;  %v642_v16 = vsub.f32 0.0, %v1163_v61 }
 0x3ce   :  { %v614_v21 = vmul.f32 %v609_v63, %v1163_v61 }
 0x3cf   :  { %662 = vrot.lane.b32.xlu0 %v658_v62, %s875_s30  ;;  %v650_v17 = vmul.f32 %v645_v60, %v642_v16 }
 0x3d3   :  { %626 = vrot.lane.b32.xlu0 %v622_v2, %s875_s30 }
 0x3d7   :  { %634 = vrot.lane.b32.xlu0 %v941_v0, %s876_s12 }
 0x3db   :  { %693 = vperm.xlu0 %848, %v684_v6   ;;  %v779_v7 = vpop.f32.mrb[2].mxu1 }
 0x3dc   :  { %v780_v41 = vpop.f32.mrb[3].mxu1 }
 0x3dd   :  { %v781_v8 = vadd.f32 %v780_v41, %v779_v7 }
 0x3df   :  { %v605_v10 = vadd.f32 %v781_v8, %v743_v56  ;;  %851 = vset.pattern.permute.xlu0 %v877_v11 }
 0x3e1   :  { %v659_v51 = vmul.f32 %v655_v3, %v605_v10  ;;  %v623_v13 = vmul.f32 %v619_v5, %v605_v10  ;;  %v685_v0 = vadd.f32 %v681_v14, %v605_v10  ;;  %v615_v32 = vmul.f32 %v611_v12, %v605_v10 }
 0x3e3   :  { %664 = vrot.lane.b32.xlu1 %v659_v51, %s875_s30 }
 0x3e7   :  { %628 = vrot.lane.b32.xlu1 %v623_v13, %s875_s30 }
 0x3eb   :  { %636 = vrot.lane.b32.xlu1 %v946_v1, %s876_s12  ;;  %v643_v1 = vsub.f32 0.0, %v605_v10 }
 0x3ed   :  { %v651_v26 = vmul.f32 %v647_v9, %v643_v1 }
 0x3ef   :  { %698 = vperm.xlu1 %849, %v685_v0  }
 0x3f3   :  { %850 = vset.pattern.permute.xlu1 %v877_v11 }
 0x441   :  { %v663_v18 = vpop.permute.xlu0 %662 }
 0x442   :  { %v668_v19 = vadd.f32 %v663_v18, %v650_v17 }
 0x444   :  { %v676_v57 = vadd.f32 %v671_v15, %v668_v19 }
 0x445   :  { %v627_v20 = vpop.permute.xlu0 %626 }
 0x446   :  { %705 = vperm.xlu1 %850, %v676_v57   ;;  %v632_v22 = vadd.f32 %v627_v20, %v614_v21 }
 0x449   :  { %v635_v23 = vpop.permute.xlu0 %634 }
 0x44a   :  { %v640_v24 = vadd.f32 %v635_v23, %v632_v22 }
 0x44c   :  { %717 = vperm.xlu1 %850, %v640_v24  }
 0x455   :  { %v665_v28 = vpop.permute.xlu1 %664 }
 0x456   :  { %v669_v29 = vadd.f32 %v665_v28, %v651_v26 }
 0x458   :  { %v677_v30 = vadd.f32 %v673_v25, %v669_v29 }
 0x459   :  { %v629_v31 = vpop.permute.xlu1 %628 }
 0x45a   :  { %710 = vperm.xlu0 %851, %v677_v30   ;;  %v633_v33 = vadd.f32 %v629_v31, %v615_v32  ;;  %v694_v38 = vpop.permute.xlu0 %693 }
 0x45b   :  { %v701_v40 = vsel %vm690_vm6, %v694_v38, %v1163_v61 }
 0x45d   :  { %v637_v34 = vpop.permute.xlu1 %636 }
 0x45e   :  { %v641_v35 = vadd.f32 %v637_v34, %v633_v33 }
 0x460   :  { %722 = vperm.xlu1 %850, %v641_v35  }
 0x46e   :  { %v699_v37 = vpop.permute.xlu1 %698 }
 0x46f   :  { %v702_v46 = vsel %vm690_vm6, %v699_v37, %v605_v10 }
 0x4c5   :  { %v706_v39 = vpop.permute.xlu1 %705 }
 0x4c6   :  { %v713_v42 = vsel %vm689_vm7, %v706_v39, %v701_v40 }
 0x4cb   :  { %v718_v43 = vpop.permute.xlu1 %717 }
 0x4cc   :  { %v725_v44 = vsel %vm688_vm8, %v718_v43, %v713_v42 }
 0x4cd   :  { %727 = vst [vmem:[%s1191_s11] sm:$0xff] %v725_v44 }
 0x4d9   :  { %v711_v45 = vpop.permute.xlu0 %710 }
 0x4da   :  { %v714_v47 = vsel %vm689_vm7, %v711_v45, %v702_v46 }
 0x4df   :  { %v723_v48 = vpop.permute.xlu1 %722 }
 0x4e0   :  { %v726_v27 = vsel %vm688_vm8, %v723_v48, %v714_v47 }
 0x4e1   :  { %728 = vst [vmem:[%s1191_s11 + $0x8] sm:$0xff] %v726_v27 }

</bundles_post_ra>
